<compile_context>
chip_gen: v6e
topology: v6e:2x2x1
jax: 0.10.0
libtpu: 0.0.40
codegen_flags: <defaults>
</compile_context>

<pallas_src>
import functools

import jax
import jax.numpy as jnp
import numpy as np
from jax import lax
from jax.experimental import pallas as pl
from jax.experimental.pallas import tpu as pltpu

BN_EPS = 1e-5
VMEM_LIMIT = 64 * 1024 * 1024  # scoped-VMEM cap (well above actual per-step use)


# ----------------------------------------------------------------------------
# small helpers
# ----------------------------------------------------------------------------
def _largest_tile(dim, target, step):
    """Largest multiple of `step` that divides `dim` and is <= `target`.

    Falls back to `dim` itself (block == full axis) so no wrapper-side padding
    copy is ever required."""
    if dim <= target:
        return dim
    t = (target // step) * step
    while t >= step:
        if dim % t == 0:
            return t
        t -= step
    return dim


def bn_affine(gamma, beta, mean, var):
    scale = gamma / jnp.sqrt(var + BN_EPS)
    shift = beta - mean * scale
    return scale, shift


# ----------------------------------------------------------------------------
# Kernel 1: localUp  ->  out = relu(x @ w_eff + shift) + residual
#   x:(M,K) bf16, w_eff:(K,Cout) bf16 (BN scale folded), res:(M,Cout) bf16
#   K-tiled with an f32 VMEM accumulator; output written in bf16.
# ----------------------------------------------------------------------------
def _localup_kernel(x_ref, w_ref, b_ref, r_ref, o_ref, acc_ref):
    k = pl.program_id(1)

    @pl.when(k == 0)
    def _init():
        acc_ref[...] = jnp.zeros_like(acc_ref)

    acc_ref[...] += jnp.dot(x_ref[...], w_ref[...],
                            preferred_element_type=jnp.float32)

    @pl.when(k == pl.num_programs(1) - 1)
    def _epilogue():
        y = jnp.maximum(acc_ref[...] + b_ref[...], 0.0)          # BN shift + ReLU
        o_ref[...] = (y + r_ref[...].astype(jnp.float32)).astype(o_ref.dtype)


def localup_matmul(x, w_eff, shift, res, *, tm=512, tk=512,
                   out_dtype=jnp.bfloat16):
    M, K = x.shape
    Cout = w_eff.shape[1]
    tm = _largest_tile(M, tm, 8)       # second-minor dim: multiple of 8 (or full)
    tk = _largest_tile(K, tk, 128)     # minor dim: multiple of 128 (or full)
    shift2 = shift.reshape(1, Cout).astype(jnp.float32)

    return pl.pallas_call(
        _localup_kernel,
        out_shape=jax.ShapeDtypeStruct((M, Cout), out_dtype),
        grid_spec=pltpu.PrefetchScalarGridSpec(
            num_scalar_prefetch=0,
            grid=(M // tm, K // tk),
            in_specs=[
                pl.BlockSpec((tm, tk), lambda i, k: (i, k)),
                pl.BlockSpec((tk, Cout), lambda i, k: (k, 0)),
                pl.BlockSpec((1, Cout), lambda i, k: (0, 0)),
                pl.BlockSpec((tm, Cout), lambda i, k: (i, 0)),
            ],
            out_specs=pl.BlockSpec((tm, Cout), lambda i, k: (i, 0)),
            scratch_shapes=[pltpu.VMEM((tm, Cout), jnp.float32)],
        ),
        compiler_params=pltpu.CompilerParams(
            dimension_semantics=("parallel", "arbitrary"),
            vmem_limit_bytes=VMEM_LIMIT,
        ),
    )(x.astype(jnp.bfloat16), w_eff.astype(jnp.bfloat16), shift2,
      res.astype(jnp.bfloat16))


# ----------------------------------------------------------------------------
# Kernel 2: conv5 (3x3, BN, ReLU) fused with conv6 (1x1 + bias)
#   Input is H-padded and W-tap-expanded (3*Cin channels, bf16) and flattened
#   to rows; the kernel DMAs a (bh+2)-row halo window per (image, row-block)
#   and accumulates the 3 row-taps as plain 2-D matmuls on the MXU.
# ----------------------------------------------------------------------------
def _conv5_conv6_kernel(x5_hbm, w5_ref, b5_ref, w6_ref, b6_ref, o_ref,
                        x_win, acc_ref, sem, *, H, W, bh):
    n = pl.program_id(0)
    hb = pl.program_id(1)
    t = pl.program_id(2)                       # row tap: kh in {0, 1, 2}

    @pl.when(t == 0)
    def _load_and_init():
        # Manually DMA this (image, row-block)'s halo window from HBM once;
        # it is reused by all 3 row taps (scratch persists across the grid).
        base = (n * (H + 2) + hb * bh) * W
        cp = pltpu.make_async_copy(
            x5_hbm.at[pl.ds(base, (bh + 2) * W)], x_win, sem)
        cp.start()
        cp.wait()
        acc_ref[...] = jnp.zeros_like(acc_ref)

    # Rows [t*W, t*W + bh*W) of the window line up 1:1 with the bh*W output
    # pixels of this block, so each tap is a plain 2-D matmul.
    start = pl.multiple_of(t * W, W)
    xs = x_win[pl.ds(start, bh * W), :]                    # (bh*W, 3*Cin) bf16
    acc_ref[...] += jnp.dot(xs, w5_ref[...],
                            preferred_element_type=jnp.float32)

    @pl.when(t == pl.num_programs(2) - 1)
    def _epilogue():
        # conv5 epilogue: BN shift + ReLU on the resident f32 accumulator.
        y = jnp.maximum(acc_ref[...] + b5_ref[...], 0.0)
        # Fused conv6 (Dropout2d identity in eval; 1x1 conv + bias), with a
        # lane-dense (>=128) padded output channel dim.
        z = jnp.dot(y.astype(jnp.bfloat16), w6_ref[...],
                    preferred_element_type=jnp.float32) + b6_ref[...]
        o_ref[...] = z.astype(o_ref.dtype)


def conv5_conv6(x_nhwc, w5_eff, shift5, w6, bias6, *, bh=8,
                out_dtype=jnp.float32):
    """x_nhwc:(N,H,W,Cin) bf16 ; w5_eff:(3,3,Cin,inter) bf16 (BN scale folded);
    shift5:(inter,) f32 ; w6:(inter,out_ch) bf16 ; bias6:(out_ch,) f32."""
    N, H, W, Cin = x_nhwc.shape
    inter = w5_eff.shape[-1]
    out_ch = w6.shape[-1]
    out_pad = max(128, ((out_ch + 127) // 128) * 128)

    bh = _largest_tile(H, bh, 1)
    if (bh * W) % 8 != 0:
        raise NotImplementedError("row-block * width must be a multiple of 8")
    nh = H // bh

    # Zero-pad H and W (the conv's padding=1), expand only the W taps into
    # channels (3x, bf16) so each kernel tile is a contiguous 2-D row range.
    xp = jnp.pad(x_nhwc, ((0, 0), (1, 1), (1, 1), (0, 0)))
    xw = jnp.concatenate([xp[:, :, kw:kw + W, :] for kw in range(3)], axis=-1)
    x5 = xw.reshape(N * (H + 2) * W, 3 * Cin).astype(jnp.bfloat16)

    w5_flat = w5_eff.reshape(3, 3 * Cin, inter).astype(jnp.bfloat16)
    b5 = shift5.reshape(1, inter).astype(jnp.float32)
    w6_p = jnp.pad(w6, ((0, 0), (0, out_pad - out_ch))).astype(jnp.bfloat16)
    b6_p = jnp.pad(bias6, (0, out_pad - out_ch)).reshape(1, out_pad)
    b6_p = b6_p.astype(jnp.float32)

    kernel = functools.partial(_conv5_conv6_kernel, H=H, W=W, bh=bh)
    out = pl.pallas_call(
        kernel,
        out_shape=jax.ShapeDtypeStruct((N * H * W, out_pad), out_dtype),
        grid_spec=pltpu.PrefetchScalarGridSpec(
            num_scalar_prefetch=0,
            grid=(N, nh, 3),
            in_specs=[
                pl.BlockSpec(memory_space=pl.ANY),      # halo'd input stays in HBM
                pl.BlockSpec((None, 3 * Cin, inter), lambda n, h, t: (t, 0, 0)),
                pl.BlockSpec((1, inter), lambda n, h, t: (0, 0)),
                pl.BlockSpec((inter, out_pad), lambda n, h, t: (0, 0)),
                pl.BlockSpec((1, out_pad), lambda n, h, t: (0, 0)),
            ],
            out_specs=pl.BlockSpec((bh * W, out_pad),
                                   lambda n, h, t: (n * nh + h, 0)),
            scratch_shapes=[
                pltpu.VMEM(((bh + 2) * W, 3 * Cin), jnp.bfloat16),   # halo window
                pltpu.VMEM((bh * W, inter), jnp.float32),            # conv5 accum
                pltpu.SemaphoreType.DMA,
            ],
        ),
        compiler_params=pltpu.CompilerParams(
            dimension_semantics=("parallel", "parallel", "arbitrary"),
            vmem_limit_bytes=VMEM_LIMIT,
        ),
    )(x5, w5_flat, b5, w6_p, b6_p)

    return out[:, :out_ch].reshape(N, H, W, out_ch)


# ----------------------------------------------------------------------------
# Plain-JAX glue: bilinear upsample (align_corners=True)
# ----------------------------------------------------------------------------
def upsample_bilinear_ac(x, out_h, out_w):
    """x: (N,H,W,C) -> (N,out_h,out_w,C), bilinear, align_corners=True."""
    n, h, w, c = x.shape

    def coords(in_sz, out_sz):
        if out_sz == 1:
            return jnp.zeros((1,), jnp.float32)
        return jnp.arange(out_sz, dtype=jnp.float32) * ((in_sz - 1) / (out_sz - 1))

    ys = coords(h, out_h)
    xs = coords(w, out_w)
    y0 = jnp.floor(ys)
    x0 = jnp.floor(xs)
    wy = (ys - y0)[None, :, None, None]
    wx = (xs - x0)[None, None, :, None]
    y0 = y0.astype(jnp.int32)
    x0 = x0.astype(jnp.int32)
    y1 = jnp.minimum(y0 + 1, h - 1)
    x1 = jnp.minimum(x0 + 1, w - 1)

    rows0 = x[:, y0, :, :]
    rows1 = x[:, y1, :, :]
    r = rows0 * (1.0 - wy) + rows1 * wy
    cols0 = r[:, :, x0, :]
    cols1 = r[:, :, x1, :]
    return cols0 * (1.0 - wx) + cols1 * wx


# ----------------------------------------------------------------------------
# Head forward (Pallas-backed)
# ----------------------------------------------------------------------------
def head_forward(params, c1, c2, c3, c4, c20, c30, c40, *,
                 tm=512, tk=512, bh=8):
    # c1, c20, c30, c40 are accepted but unused, mirroring the PyTorch forward.
    del c1, c20, c30, c40
    to_nhwc = lambda t: jnp.transpose(t, (0, 2, 3, 1)).astype(jnp.float32)
    c2n, c3n, c4n = to_nhwc(c2), to_nhwc(c3), to_nhwc(c4)
    in_ch = params["lu4_w"].shape[1]

    # ---- localUp4(c3, c4):  relu(bn(conv1x1(c3))) + up(c4) ----
    bsz, h3, w3, c3_ch = c3n.shape
    s4, b4 = bn_affine(*params["lu4_bn"])
    w4_eff = (params["lu4_w"] * s4[None, :]).astype(jnp.bfloat16)
    c4_up = upsample_bilinear_ac(c4n, h3, w3).astype(jnp.bfloat16)
    out = localup_matmul(c3n.reshape(-1, c3_ch), w4_eff, b4,
                         c4_up.reshape(-1, in_ch), tm=tm, tk=tk)
    out = out.reshape(bsz, h3, w3, in_ch)                  # bf16

    # ---- localUp3(c2, out):  relu(bn(conv1x1(c2))) + up(out) ----
    bsz, h2, w2, c2_ch = c2n.shape
    s3, b3 = bn_affine(*params["lu3_bn"])
    w3_eff = (params["lu3_w"] * s3[None, :]).astype(jnp.bfloat16)
    out_up = upsample_bilinear_ac(out, h2, w2).astype(jnp.bfloat16)
    out = localup_matmul(c2n.reshape(-1, c2_ch), w3_eff, b3,
                         out_up.reshape(-1, in_ch), tm=tm, tk=tk)
    out = out.reshape(bsz, h2, w2, in_ch)                  # bf16

    # ---- conv5 (3x3 + BN + ReLU) fused with conv6 (Dropout2d + 1x1 + bias) ----
    # TODO(synk): Dropout2d(0.1) is treated as identity (eval mode); the
    # training-mode channel dropout mask is not implemented.
    s5, b5 = bn_affine(*params["c5_bn"])
    w5_eff = (params["c5_w"] * s5[None, None, None, :]).astype(jnp.bfloat16)
    w6 = params["c6_w"].astype(jnp.bfloat16)
    out6 = conv5_conv6(out, w5_eff, b5, w6, params["c6_b"], bh=bh)
    return jnp.transpose(out6, (0, 3, 1, 2))               # back to NCHW


# ----------------------------------------------------------------------------
# Pure-JAX reference.  It mirrors the kernels' mixed-precision scheme (bf16
# matmul operands / bf16 stage boundaries, f32 accumulation) so the comparison
# isolates Pallas-kernel correctness from the deliberate bf16 design choice.
# ----------------------------------------------------------------------------
def ref_forward(params, c2, c3, c4):
    f32 = lambda a: a.astype(jnp.float32)
    b16 = lambda a: a.astype(jnp.bfloat16)
    to_nhwc = lambda t: jnp.transpose(t, (0, 2, 3, 1)).astype(jnp.float32)
    c2n, c3n, c4n = to_nhwc(c2), to_nhwc(c3), to_nhwc(c4)

    def localup(x_nhwc, res_bf16, w, bn):
        s, b = bn_affine(*bn)
        w_eff = f32(b16(w * s[None, :]))
        y = jnp.einsum("nhwc,co->nhwo", f32(b16(x_nhwc)), w_eff,
                       preferred_element_type=jnp.float32)
        return b16(jnp.maximum(y + b, 0.0) + f32(res_bf16))

    bsz, h3, w3, _ = c3n.shape
    out = localup(c3n, b16(upsample_bilinear_ac(c4n, h3, w3)),
                  params["lu4_w"], params["lu4_bn"])

    bsz, h2, w2, _ = c2n.shape
    out = localup(c2n, b16(upsample_bilinear_ac(out, h2, w2)),
                  params["lu3_w"], params["lu3_bn"])

    s5, b5 = bn_affine(*params["c5_bn"])
    w5_eff = f32(b16(params["c5_w"] * s5[None, None, None, :]))
    y = lax.conv_general_dilated(f32(out), w5_eff, (1, 1), "SAME",
                                 dimension_numbers=("NHWC", "HWIO", "NHWC"))
    y = jnp.maximum(y + b5, 0.0)
    z = jnp.einsum("nhwc,co->nhwo", f32(b16(y)), f32(b16(params["c6_w"])),
                   preferred_element_type=jnp.float32) + params["c6_b"]
    return jnp.transpose(z, (0, 3, 1, 2))


# ----------------------------------------------------------------------------
# Deterministic parameter init
# ----------------------------------------------------------------------------
def init_params(key, in_ch, inter_ch, out_ch, c2_ch, c3_ch):
    ks = jax.random.split(key, 8)

    def bn(k, c):
        k1, k2, k3, k4 = jax.random.split(k, 4)
        gamma = 1.0 + 0.1 * jax.random.normal(k1, (c,), jnp.float32)
        beta = 0.1 * jax.random.normal(k2, (c,), jnp.float32)
        mean = 0.1 * jax.random.normal(k3, (c,), jnp.float32)
        var = 1.0 + 0.1 * jnp.abs(jax.random.normal(k4, (c,), jnp.float32))
        return gamma, beta, mean, var

    return {
        # localUp4.connect: 1x1 conv (c3_ch -> in_ch), stored as (Cin, Cout)
        "lu4_w": 0.1 * jax.random.normal(ks[0], (c3_ch, in_ch), jnp.float32),
        "lu4_bn": bn(ks[1], in_ch),
        # localUp3.connect: 1x1 conv (c2_ch -> in_ch)
        "lu3_w": 0.1 * jax.random.normal(ks[2], (c2_ch, in_ch), jnp.float32),
        "lu3_bn": bn(ks[3], in_ch),
        # conv5: 3x3 conv (in_ch -> inter_ch), HWIO layout
        "c5_w": 0.1 * jax.random.normal(ks[4], (3, 3, in_ch, inter_ch), jnp.float32),
        "c5_bn": bn(ks[5], inter_ch),
        # conv6: 1x1 conv (inter_ch -> out_ch) with bias
        "c6_w": 0.1 * jax.random.normal(ks[6], (inter_ch, out_ch), jnp.float32),
        "c6_b": 0.1 * jax.random.normal(ks[7], (out_ch,), jnp.float32),
    }


if __name__ == "__main__":
    key = jax.random.PRNGKey(0)
    kp, k1, k2, k3, k4 = jax.random.split(key, 5)

    # Small stand-in shapes (original hardcodes in_ch=2048, c2=512ch, c3=1024ch);
    # channel counts are chosen so every grid axis (M, K, row-blocks, taps)
    # runs with more than one step.
    batch, in_ch, out_ch = 2, 128, 5
    inter_ch = in_ch // 4            # 32
    c2_ch, c3_ch = 256, 256
    H2, H3, H4 = 16, 8, 4

    params = init_params(kp, in_ch, inter_ch, out_ch, c2_ch, c3_ch)

    c2 = jax.random.normal(k1, (batch, c2_ch, H2, H2), jnp.float32)
    c3 = jax.random.normal(k2, (batch, c3_ch, H3, H3), jnp.float32)
    c4 = jax.random.normal(k3, (batch, in_ch, H4, H4), jnp.float32)
    # Unused inputs (kept to mirror the PyTorch forward signature).
    c1 = jax.random.normal(k4, (batch, 64, 32, 32), jnp.float32)
    c20 = jnp.zeros((1,), jnp.float32)
    c30 = jnp.zeros((1,), jnp.float32)
    c40 = jnp.zeros((1,), jnp.float32)

    # tm/tk deliberately small here so the toy shapes still exercise multi-
    # block M and K grids (defaults are 512/512 for real-scale feature maps).
    fwd = jax.jit(functools.partial(head_forward, tm=256, tk=128, bh=8))
    out = jax.block_until_ready(fwd(params, c1, c2, c3, c4, c20, c30, c40))

    ref = jax.block_until_ready(ref_forward(params, c2, c3, c4))
    assert out.shape == (batch, out_ch, H2, H2), out.shape
    np.testing.assert_allclose(np.asarray(out, dtype=np.float32),
                               np.asarray(ref, dtype=np.float32),
                               atol=1e-2, rtol=1e-2)

    print("KERNEL_OK")
</pallas_src>

<mosaic_0001>
module attributes {stable_mosaic.version = 11 : i64} {
  func.func @_localup_kernel(%arg0: i32, %arg1: i32, %arg2: memref<128x128xbf16, #tpu.memory_space<vmem>>, %arg3: memref<128x128xbf16, #tpu.memory_space<vmem>>, %arg4: memref<1x128xf32, #tpu.memory_space<vmem>>, %arg5: memref<128x128xbf16, #tpu.memory_space<vmem>>, %arg6: memref<128x128xbf16, #tpu.memory_space<vmem>>, %arg7: memref<128x128xf32, #tpu.memory_space<vmem>>) attributes {dimension_semantics = [#tpu.dimension_semantics<parallel>, #tpu.dimension_semantics<arbitrary>], iteration_bounds = array<i64: 1, 2>, scalar_prefetch = 0 : i64, scratch_operands = 1 : i64, tpu.core_type = #tpu.core_type<tc>, window_params = [{transform_indices = @transform_0, window_bounds = array<i64: 128, 128>}, {transform_indices = @transform_1, window_bounds = array<i64: 128, 128>}, {pipeline_mode = #tpu.pipeline_mode<synchronous>, transform_indices = @transform_2, window_bounds = array<i64: 1, 128>}, {transform_indices = @transform_3, window_bounds = array<i64: 128, 128>}, {transform_indices = @transform_4, window_bounds = array<i64: 128, 128>}]} {
    %c0_i32 = arith.constant 0 : i32
    %0 = arith.cmpi eq, %arg1, %c0_i32 : i32
    %1 = arith.extui %0 : i1 to i32
    %c0_i32_0 = arith.constant 0 : i32
    %2 = arith.cmpi ne, %1, %c0_i32_0 : i32
    scf.if %2 {
      %cst_9 = arith.constant 0.000000e+00 : f32
      %12 = vector.broadcast %cst_9 : f32 to vector<128x128xf32>
      %c0_10 = arith.constant 0 : index
      %c0_11 = arith.constant 0 : index
      %13 = vector.load %arg7[%c0_10, %c0_11] : memref<128x128xf32, #tpu.memory_space<vmem>>, vector<128x128xf32>
      tpu.vector_store %arg7[%c0_10, %c0_11], %12 {strides = array<i32>} : memref<128x128xf32, #tpu.memory_space<vmem>>, vector<128x128xf32>,
    } else {
    }
    %c0 = arith.constant 0 : index
    %c0_1 = arith.constant 0 : index
    %3 = vector.load %arg7[%c0, %c0_1] : memref<128x128xf32, #tpu.memory_space<vmem>>, vector<128x128xf32>
    %c0_2 = arith.constant 0 : index
    %c0_3 = arith.constant 0 : index
    %4 = vector.load %arg2[%c0_2, %c0_3] : memref<128x128xbf16, #tpu.memory_space<vmem>>, vector<128x128xbf16>
    %c0_4 = arith.constant 0 : index
    %c0_5 = arith.constant 0 : index
    %5 = vector.load %arg3[%c0_4, %c0_5] : memref<128x128xbf16, #tpu.memory_space<vmem>>, vector<128x128xbf16>
    %cst = arith.constant dense<0.000000e+00> : vector<128x128xf32>
    %6 = tpu.matmul %4, %5, %cst {dimension_numbers = #tpu.dot_dimension_numbers<[1], [0], [0], [1], [0, 0, 1, 1], [], []>} : vector<128x128xbf16>, vector<128x128xbf16>, vector<128x128xf32> -> vector<128x128xf32>
    %7 = arith.addf %3, %6 : vector<128x128xf32>
    %c0_6 = arith.constant 0 : index
    %c0_7 = arith.constant 0 : index
    %8 = vector.load %arg7[%c0_6, %c0_7] : memref<128x128xf32, #tpu.memory_space<vmem>>, vector<128x128xf32>
    tpu.vector_store %arg7[%c0_6, %c0_7], %7 {strides = array<i32>} : memref<128x128xf32, #tpu.memory_space<vmem>>, vector<128x128xf32>,
    %c1_i32 = arith.constant 1 : i32
    %9 = arith.cmpi eq, %arg1, %c1_i32 : i32
    %10 = arith.extui %9 : i1 to i32
    %c0_i32_8 = arith.constant 0 : i32
    %11 = arith.cmpi ne, %10, %c0_i32_8 : i32
    scf.if %11 {
      %c0_9 = arith.constant 0 : index
      %c0_10 = arith.constant 0 : index
      %12 = vector.load %arg7[%c0_9, %c0_10] : memref<128x128xf32, #tpu.memory_space<vmem>>, vector<128x128xf32>
      %c0_11 = arith.constant 0 : index
      %c0_12 = arith.constant 0 : index
      %13 = vector.load %arg4[%c0_11, %c0_12] : memref<1x128xf32, #tpu.memory_space<vmem>>, vector<1x128xf32>
      %14 = vector.broadcast %13 : vector<1x128xf32> to vector<128x128xf32>
      %15 = arith.addf %12, %14 : vector<128x128xf32>
      %cst_13 = arith.constant 0.000000e+00 : f32
      %16 = vector.broadcast %cst_13 : f32 to vector<128x128xf32>
      %17 = arith.maximumf %15, %16 : vector<128x128xf32>
      %c0_14 = arith.constant 0 : index
      %c0_15 = arith.constant 0 : index
      %18 = vector.load %arg5[%c0_14, %c0_15] : memref<128x128xbf16, #tpu.memory_space<vmem>>, vector<128x128xbf16>
      %19 = arith.extf %18 : vector<128x128xbf16> to vector<128x128xf32>
      %20 = arith.addf %17, %19 : vector<128x128xf32>
      %21 = arith.truncf %20 : vector<128x128xf32> to vector<128x128xbf16>
      %c0_16 = arith.constant 0 : index
      %c0_17 = arith.constant 0 : index
      %22 = vector.load %arg6[%c0_16, %c0_17] : memref<128x128xbf16, #tpu.memory_space<vmem>>, vector<128x128xbf16>
      tpu.vector_store %arg6[%c0_16, %c0_17], %21 {strides = array<i32>} : memref<128x128xbf16, #tpu.memory_space<vmem>>, vector<128x128xbf16>,
    } else {
    }
    return
  }
  func.func @transform_0(%arg0: i32, %arg1: i32) -> (i32, i32) {
    %c0_i32 = arith.constant 0 : i32
    return %arg0, %arg1 : i32, i32
  }
  func.func @transform_1(%arg0: i32, %arg1: i32) -> (i32, i32) {
    %c0_i32 = arith.constant 0 : i32
    %c0_i32_0 = arith.constant 0 : i32
    return %arg1, %c0_i32 : i32, i32
  }
  func.func @transform_2(%arg0: i32, %arg1: i32) -> (i32, i32) {
    %c0_i32 = arith.constant 0 : i32
    %c0_i32_0 = arith.constant 0 : i32
    %c0_i32_1 = arith.constant 0 : i32
    return %c0_i32, %c0_i32_0 : i32, i32
  }
  func.func @transform_3(%arg0: i32, %arg1: i32) -> (i32, i32) {
    %c0_i32 = arith.constant 0 : i32
    %c0_i32_0 = arith.constant 0 : i32
    return %arg0, %c0_i32 : i32, i32
  }
  func.func @transform_4(%arg0: i32, %arg1: i32) -> (i32, i32) {
    %c0_i32 = arith.constant 0 : i32
    %c0_i32_0 = arith.constant 0 : i32
    return %arg0, %c0_i32 : i32, i32
  }
}

module attributes {stable_mosaic.version = 11 : i64} {
  func.func @_localup_kernel(%arg0: i32, %arg1: i32, %arg2: memref<256x128xbf16, #tpu.memory_space<vmem>>, %arg3: memref<128x128xbf16, #tpu.memory_space<vmem>>, %arg4: memref<1x128xf32, #tpu.memory_space<vmem>>, %arg5: memref<256x128xbf16, #tpu.memory_space<vmem>>, %arg6: memref<256x128xbf16, #tpu.memory_space<vmem>>, %arg7: memref<256x128xf32, #tpu.memory_space<vmem>>) attributes {dimension_semantics = [#tpu.dimension_semantics<parallel>, #tpu.dimension_semantics<arbitrary>], iteration_bounds = array<i64: 2, 2>, scalar_prefetch = 0 : i64, scratch_operands = 1 : i64, tpu.core_type = #tpu.core_type<tc>, window_params = [{transform_indices = @transform_0, window_bounds = array<i64: 256, 128>}, {transform_indices = @transform_1, window_bounds = array<i64: 128, 128>}, {pipeline_mode = #tpu.pipeline_mode<synchronous>, transform_indices = @transform_2, window_bounds = array<i64: 1, 128>}, {transform_indices = @transform_3, window_bounds = array<i64: 256, 128>}, {transform_indices = @transform_4, window_bounds = array<i64: 256, 128>}]} {
    %c0_i32 = arith.constant 0 : i32
    %0 = arith.cmpi eq, %arg1, %c0_i32 : i32
    %1 = arith.extui %0 : i1 to i32
    %c0_i32_0 = arith.constant 0 : i32
    %2 = arith.cmpi ne, %1, %c0_i32_0 : i32
    scf.if %2 {
      %cst_9 = arith.constant 0.000000e+00 : f32
      %12 = vector.broadcast %cst_9 : f32 to vector<256x128xf32>
      %c0_10 = arith.constant 0 : index
      %c0_11 = arith.constant 0 : index
      %13 = vector.load %arg7[%c0_10, %c0_11] : memref<256x128xf32, #tpu.memory_space<vmem>>, vector<256x128xf32>
      tpu.vector_store %arg7[%c0_10, %c0_11], %12 {strides = array<i32>} : memref<256x128xf32, #tpu.memory_space<vmem>>, vector<256x128xf32>,
    } else {
    }
    %c0 = arith.constant 0 : index
    %c0_1 = arith.constant 0 : index
    %3 = vector.load %arg7[%c0, %c0_1] : memref<256x128xf32, #tpu.memory_space<vmem>>, vector<256x128xf32>
    %c0_2 = arith.constant 0 : index
    %c0_3 = arith.constant 0 : index
    %4 = vector.load %arg2[%c0_2, %c0_3] : memref<256x128xbf16, #tpu.memory_space<vmem>>, vector<256x128xbf16>
    %c0_4 = arith.constant 0 : index
    %c0_5 = arith.constant 0 : index
    %5 = vector.load %arg3[%c0_4, %c0_5] : memref<128x128xbf16, #tpu.memory_space<vmem>>, vector<128x128xbf16>
    %cst = arith.constant dense<0.000000e+00> : vector<256x128xf32>
    %6 = tpu.matmul %4, %5, %cst {dimension_numbers = #tpu.dot_dimension_numbers<[1], [0], [0], [1], [0, 0, 1, 1], [], []>} : vector<256x128xbf16>, vector<128x128xbf16>, vector<256x128xf32> -> vector<256x128xf32>
    %7 = arith.addf %3, %6 : vector<256x128xf32>
    %c0_6 = arith.constant 0 : index
    %c0_7 = arith.constant 0 : index
    %8 = vector.load %arg7[%c0_6, %c0_7] : memref<256x128xf32, #tpu.memory_space<vmem>>, vector<256x128xf32>
    tpu.vector_store %arg7[%c0_6, %c0_7], %7 {strides = array<i32>} : memref<256x128xf32, #tpu.memory_space<vmem>>, vector<256x128xf32>,
    %c1_i32 = arith.constant 1 : i32
    %9 = arith.cmpi eq, %arg1, %c1_i32 : i32
    %10 = arith.extui %9 : i1 to i32
    %c0_i32_8 = arith.constant 0 : i32
    %11 = arith.cmpi ne, %10, %c0_i32_8 : i32
    scf.if %11 {
      %c0_9 = arith.constant 0 : index
      %c0_10 = arith.constant 0 : index
      %12 = vector.load %arg7[%c0_9, %c0_10] : memref<256x128xf32, #tpu.memory_space<vmem>>, vector<256x128xf32>
      %c0_11 = arith.constant 0 : index
      %c0_12 = arith.constant 0 : index
      %13 = vector.load %arg4[%c0_11, %c0_12] : memref<1x128xf32, #tpu.memory_space<vmem>>, vector<1x128xf32>
      %14 = vector.broadcast %13 : vector<1x128xf32> to vector<256x128xf32>
      %15 = arith.addf %12, %14 : vector<256x128xf32>
      %cst_13 = arith.constant 0.000000e+00 : f32
      %16 = vector.broadcast %cst_13 : f32 to vector<256x128xf32>
      %17 = arith.maximumf %15, %16 : vector<256x128xf32>
      %c0_14 = arith.constant 0 : index
      %c0_15 = arith.constant 0 : index
      %18 = vector.load %arg5[%c0_14, %c0_15] : memref<256x128xbf16, #tpu.memory_space<vmem>>, vector<256x128xbf16>
      %19 = arith.extf %18 : vector<256x128xbf16> to vector<256x128xf32>
      %20 = arith.addf %17, %19 : vector<256x128xf32>
      %21 = arith.truncf %20 : vector<256x128xf32> to vector<256x128xbf16>
      %c0_16 = arith.constant 0 : index
      %c0_17 = arith.constant 0 : index
      %22 = vector.load %arg6[%c0_16, %c0_17] : memref<256x128xbf16, #tpu.memory_space<vmem>>, vector<256x128xbf16>
      tpu.vector_store %arg6[%c0_16, %c0_17], %21 {strides = array<i32>} : memref<256x128xbf16, #tpu.memory_space<vmem>>, vector<256x128xbf16>,
    } else {
    }
    return
  }
  func.func @transform_0(%arg0: i32, %arg1: i32) -> (i32, i32) {
    %c0_i32 = arith.constant 0 : i32
    return %arg0, %arg1 : i32, i32
  }
  func.func @transform_1(%arg0: i32, %arg1: i32) -> (i32, i32) {
    %c0_i32 = arith.constant 0 : i32
    %c0_i32_0 = arith.constant 0 : i32
    return %arg1, %c0_i32 : i32, i32
  }
  func.func @transform_2(%arg0: i32, %arg1: i32) -> (i32, i32) {
    %c0_i32 = arith.constant 0 : i32
    %c0_i32_0 = arith.constant 0 : i32
    %c0_i32_1 = arith.constant 0 : i32
    return %c0_i32, %c0_i32_0 : i32, i32
  }
  func.func @transform_3(%arg0: i32, %arg1: i32) -> (i32, i32) {
    %c0_i32 = arith.constant 0 : i32
    %c0_i32_0 = arith.constant 0 : i32
    return %arg0, %c0_i32 : i32, i32
  }
  func.func @transform_4(%arg0: i32, %arg1: i32) -> (i32, i32) {
    %c0_i32 = arith.constant 0 : i32
    %c0_i32_0 = arith.constant 0 : i32
    return %arg0, %c0_i32 : i32, i32
  }
}

module attributes {stable_mosaic.version = 11 : i64} {
  func.func @_conv5_conv6_kernel(%arg0: i32, %arg1: i32, %arg2: i32, %arg3: memref<576x384xbf16, #tpu.memory_space<any>>, %arg4: memref<1x384x32xbf16, #tpu.memory_space<vmem>>, %arg5: memref<1x32xf32, #tpu.memory_space<vmem>>, %arg6: memref<32x128xbf16, #tpu.memory_space<vmem>>, %arg7: memref<1x128xf32, #tpu.memory_space<vmem>>, %arg8: memref<128x128xf32, #tpu.memory_space<vmem>>, %arg9: memref<160x384xbf16, #tpu.memory_space<vmem>>, %arg10: memref<128x32xf32, #tpu.memory_space<vmem>>, %arg11: memref<!tpu.dma_semaphore, #tpu.memory_space<semaphore_mem>>) attributes {dimension_semantics = [#tpu.dimension_semantics<parallel>, #tpu.dimension_semantics<parallel>, #tpu.dimension_semantics<arbitrary>], iteration_bounds = array<i64: 2, 2, 3>, scalar_prefetch = 0 : i64, scratch_operands = 3 : i64, tpu.core_type = #tpu.core_type<tc>, window_params = [{}, {transform_indices = @transform_1, window_bounds = array<i64: 1, 384, 32>}, {pipeline_mode = #tpu.pipeline_mode<synchronous>, transform_indices = @transform_2, window_bounds = array<i64: 1, 32>}, {pipeline_mode = #tpu.pipeline_mode<synchronous>, transform_indices = @transform_3, window_bounds = array<i64: 32, 128>}, {pipeline_mode = #tpu.pipeline_mode<synchronous>, transform_indices = @transform_4, window_bounds = array<i64: 1, 128>}, {transform_indices = @transform_5, window_bounds = array<i64: 128, 128>}]} {
    %c0_i32 = arith.constant 0 : i32
    %0 = arith.cmpi eq, %arg2, %c0_i32 : i32
    %1 = arith.extui %0 : i1 to i32
    %c0_i32_0 = arith.constant 0 : i32
    %2 = arith.cmpi ne, %1, %c0_i32_0 : i32
    scf.if %2 {
      %c18_i32 = arith.constant 18 : i32
      %16 = arith.muli %arg0, %c18_i32 : i32
      %c8_i32 = arith.constant 8 : i32
      %17 = arith.muli %arg1, %c8_i32 : i32
      %18 = arith.addi %16, %17 : i32
      %c16_i32_9 = arith.constant 16 : i32
      %19 = arith.muli %18, %c16_i32_9 : i32
      %c0_i32_10 = arith.constant 0 : i32
      %20 = tpu.memref_slice %arg3[%19, %c0_i32_10] : memref<576x384xbf16, #tpu.memory_space<any>> -> memref<160x384xbf16, #tpu.memory_space<any>>
      tpu.enqueue_dma source(%20 : memref<160x384xbf16, #tpu.memory_space<any>>) target(%arg9 : memref<160x384xbf16, #tpu.memory_space<vmem>>) target_semaphore(%arg11 : memref<!tpu.dma_semaphore, #tpu.memory_space<semaphore_mem>>)
      %c0_i32_11 = arith.constant 0 : i32
      %21 = tpu.memref_slice %arg3[%19, %c0_i32_11] : memref<576x384xbf16, #tpu.memory_space<any>> -> memref<160x384xbf16, #tpu.memory_space<any>>
      tpu.wait_dma2 semaphore(%arg11 : memref<!tpu.dma_semaphore, #tpu.memory_space<semaphore_mem>>) src(%21 : memref<160x384xbf16, #tpu.memory_space<any>>) dst(%arg9 : memref<160x384xbf16, #tpu.memory_space<vmem>>)
      %cst_12 = arith.constant 0.000000e+00 : f32
      %22 = vector.broadcast %cst_12 : f32 to vector<128x32xf32>
      %c0_13 = arith.constant 0 : index
      %c0_14 = arith.constant 0 : index
      %23 = vector.load %arg10[%c0_13, %c0_14] : memref<128x32xf32, #tpu.memory_space<vmem>>, vector<128x32xf32>
      tpu.vector_store %arg10[%c0_13, %c0_14], %22 {strides = array<i32>} : memref<128x32xf32, #tpu.memory_space<vmem>>, vector<128x32xf32>,
    } else {
    }
    %c16_i32 = arith.constant 16 : i32
    %3 = arith.muli %arg2, %c16_i32 : i32
    %4 = tpu.assume_multiple %3, 16 : i32
    %5 = arith.index_cast %4 : i32 to index
    %c0 = arith.constant 0 : index
    %6 = vector.load %arg9[%5, %c0] : memref<160x384xbf16, #tpu.memory_space<vmem>>, vector<128x384xbf16>
    %c0_1 = arith.constant 0 : index
    %c0_2 = arith.constant 0 : index
    %7 = vector.load %arg10[%c0_1, %c0_2] : memref<128x32xf32, #tpu.memory_space<vmem>>, vector<128x32xf32>
    %c0_3 = arith.constant 0 : index
    %c0_4 = arith.constant 0 : index
    %c0_5 = arith.constant 0 : index
    %8 = vector.load %arg4[%c0_3, %c0_4, %c0_5] : memref<1x384x32xbf16, #tpu.memory_space<vmem>>, vector<1x384x32xbf16>
    %9 = vector.shape_cast %8 : vector<1x384x32xbf16> to vector<384x32xbf16>
    %cst = arith.constant dense<0.000000e+00> : vector<128x32xf32>
    %10 = tpu.matmul %6, %9, %cst {dimension_numbers = #tpu.dot_dimension_numbers<[1], [0], [0], [1], [0, 0, 1, 1], [], []>} : vector<128x384xbf16>, vector<384x32xbf16>, vector<128x32xf32> -> vector<128x32xf32>
    %11 = arith.addf %7, %10 : vector<128x32xf32>
    %c0_6 = arith.constant 0 : index
    %c0_7 = arith.constant 0 : index
    %12 = vector.load %arg10[%c0_6, %c0_7] : memref<128x32xf32, #tpu.memory_space<vmem>>, vector<128x32xf32>
    tpu.vector_store %arg10[%c0_6, %c0_7], %11 {strides = array<i32>} : memref<128x32xf32, #tpu.memory_space<vmem>>, vector<128x32xf32>,
    %c2_i32 = arith.constant 2 : i32
    %13 = arith.cmpi eq, %arg2, %c2_i32 : i32
    %14 = arith.extui %13 : i1 to i32
    %c0_i32_8 = arith.constant 0 : i32
    %15 = arith.cmpi ne, %14, %c0_i32_8 : i32
    scf.if %15 {
      %c0_9 = arith.constant 0 : index
      %c0_10 = arith.constant 0 : index
      %16 = vector.load %arg10[%c0_9, %c0_10] : memref<128x32xf32, #tpu.memory_space<vmem>>, vector<128x32xf32>
      %c0_11 = arith.constant 0 : index
      %c0_12 = arith.constant 0 : index
      %17 = vector.load %arg5[%c0_11, %c0_12] : memref<1x32xf32, #tpu.memory_space<vmem>>, vector<1x32xf32>
      %18 = vector.broadcast %17 : vector<1x32xf32> to vector<128x32xf32>
      %19 = arith.addf %16, %18 : vector<128x32xf32>
      %cst_13 = arith.constant 0.000000e+00 : f32
      %20 = vector.broadcast %cst_13 : f32 to vector<128x32xf32>
      %21 = arith.maximumf %19, %20 : vector<128x32xf32>
      %22 = arith.truncf %21 : vector<128x32xf32> to vector<128x32xbf16>
      %c0_14 = arith.constant 0 : index
      %c0_15 = arith.constant 0 : index
      %23 = vector.load %arg6[%c0_14, %c0_15] : memref<32x128xbf16, #tpu.memory_space<vmem>>, vector<32x128xbf16>
      %cst_16 = arith.constant dense<0.000000e+00> : vector<128x128xf32>
      %24 = tpu.matmul %22, %23, %cst_16 {dimension_numbers = #tpu.dot_dimension_numbers<[1], [0], [0], [1], [0, 0, 1, 1], [], []>} : vector<128x32xbf16>, vector<32x128xbf16>, vector<128x128xf32> -> vector<128x128xf32>
      %c0_17 = arith.constant 0 : index
      %c0_18 = arith.constant 0 : index
      %25 = vector.load %arg7[%c0_17, %c0_18] : memref<1x128xf32, #tpu.memory_space<vmem>>, vector<1x128xf32>
      %26 = vector.broadcast %25 : vector<1x128xf32> to vector<128x128xf32>
      %27 = arith.addf %24, %26 : vector<128x128xf32>
      %c0_19 = arith.constant 0 : index
      %c0_20 = arith.constant 0 : index
      %28 = vector.load %arg8[%c0_19, %c0_20] : memref<128x128xf32, #tpu.memory_space<vmem>>, vector<128x128xf32>
      tpu.vector_store %arg8[%c0_19, %c0_20], %27 {strides = array<i32>} : memref<128x128xf32, #tpu.memory_space<vmem>>, vector<128x128xf32>,
    } else {
    }
    return
  }
  func.func @transform_1(%arg0: i32, %arg1: i32, %arg2: i32) -> (i32, i32, i32) {
    %c0_i32 = arith.constant 0 : i32
    %c0_i32_0 = arith.constant 0 : i32
    %c0_i32_1 = arith.constant 0 : i32
    return %arg2, %c0_i32, %c0_i32_0 : i32, i32, i32
  }
  func.func @transform_2(%arg0: i32, %arg1: i32, %arg2: i32) -> (i32, i32) {
    %c0_i32 = arith.constant 0 : i32
    %c0_i32_0 = arith.constant 0 : i32
    %c0_i32_1 = arith.constant 0 : i32
    return %c0_i32, %c0_i32_0 : i32, i32
  }
  func.func @transform_3(%arg0: i32, %arg1: i32, %arg2: i32) -> (i32, i32) {
    %c0_i32 = arith.constant 0 : i32
    %c0_i32_0 = arith.constant 0 : i32
    %c0_i32_1 = arith.constant 0 : i32
    return %c0_i32, %c0_i32_0 : i32, i32
  }
  func.func @transform_4(%arg0: i32, %arg1: i32, %arg2: i32) -> (i32, i32) {
    %c0_i32 = arith.constant 0 : i32
    %c0_i32_0 = arith.constant 0 : i32
    %c0_i32_1 = arith.constant 0 : i32
    return %c0_i32, %c0_i32_0 : i32, i32
  }
  func.func @transform_5(%arg0: i32, %arg1: i32, %arg2: i32) -> (i32, i32) {
    %c2_i32 = arith.constant 2 : i32
    %0 = arith.muli %arg0, %c2_i32 : i32
    %1 = arith.addi %0, %arg1 : i32
    %c0_i32 = arith.constant 0 : i32
    %c0_i32_0 = arith.constant 0 : i32
    return %1, %c0_i32 : i32, i32
  }
}

</mosaic_0001>

<bundles_post_ra>
// kernel: head_forward.3
= control target key start
LH: loop header
LB: loop body
LE: loop exit
PB: predicated region body
PF: predicated region fallthrough
CT: control target
= control target key end

     0   :  { %s1280_s15 = smov 0   ;;  %s1282_s16 = smov 0   ;;  %s1454_s0 = inlined_call_operand.vmem [shape: bf16[128,256], index: 0, kind: input, shape index: {}]   ;;  %s1455_s1 = inlined_call_operand.vmem [shape: bf16[256,128], index: 1, kind: input, shape index: {}]   ;;  %s1456_s2 = inlined_call_operand.vmem [shape: f32[1,128], index: 2, kind: input, shape index: {}]   ;;  %s1457_s3 = inlined_call_operand.vmem [shape: bf16[128,128], index: 3, kind: input, shape index: {}]   ;;  %s1458_s4 = inlined_call_operand.vmem [shape: bf16[128,128], index: 4, kind: output, shape index: {}]  }
   0x1   :  { %s1284_s17 = smov 0   ;;  %s1286_s18 = smov 0  }
   0x2   :  { %s1288_s19 = smov 0  }
   0x3 LB: > { %s23_s20 = sadd.s32 1, %s1248_s18  ;;  %p42_p1 = scmp.ne.s32.totalorder %s1240_s16, %s1236_s15  ;;  %s1252_s19 = sphi %s1288_s19, %s14_s19   ;;  %s1248_s18 = sphi %s1286_s18, %s1462_s18   ;;  %s1244_s17 = sphi %s1284_s17, %s1461_s17   ;;  %s1240_s16 = sphi %s1282_s16, %s1460_s16   ;;  %s1236_s15 = sphi %s1280_s15, %s1459_s15  }
   0x4   : > { %p24_p0 = scmp.ge.s32.totalorder %s23_s20, 2  ;;  %p43_p2 = scmp.eq.s32.totalorder %s1252_s19, 0 }
   0x5   : > { %s35_s22 = sadd.s32 1, %s1240_s16  ;;  %p945_p5 = scmp.ge.s32.totalorder %s1252_s19, 2 }
   0x6   : > { %s1464_s20 = smov (%p24_p0, %s23_s20), 0  ;;  %p44_p3 = por %p43_p2, %p42_p1 }
   0x7   : > { %s31_s21 = ssub.s32 %s1248_s18, %s1464_s20  ;;  %179 = sbr.rel (%p945_p5) target bundleno = 26 (0x1a), region = 24 }
   0x8   : > { %p33_p4 = scmp.eq.s32.totalorder %s31_s21, 0 }
   0xa   : > { %s1315_s23 = scalar_select %p33_p4, %s1240_s16, %s35_s22  }
   0xc   : > { %182 = sbr.rel (!%p44_p3) target bundleno = 26 (0x1a), region = 28  ;;  %s184_s24 = sand.u32 (%p44_p3), 1, %s1240_s16  }
   0xd   : > { %s947_s25 = sshll.u32 (%p44_p3), %s1248_s18, 2  ;;  %s946_s26 = sshll.u32 (%p44_p3), %s184_s24, 6 }
   0xe   : > { %s1323_s29 = scalar_lea.vmem (%p44_p3), %s1454_s0, %s947_s25  ;;  %s186_s30 = scalar_lea.vmem (%p44_p3), [#allocation3], %s946_s26 }
   0xf   : > { %v208_v0 = vld [vmem:[%s1323_s29] sm:$0xf] (%p44_p3)  ;;  %v210_v1 = vld [vmem:[%s1323_s29 + $0x8] sm:$0xf] (%p44_p3)  ;;  %v212_v2 = vld [vmem:[%s1323_s29 + $0x10] sm:$0xf] (%p44_p3) }
  0x10   : > { %209 = vst [vmem:[%s186_s30] sm:$0xf] (%p44_p3), %v208_v0  ;;  %211 = vst [vmem:[%s186_s30 + $0x4] sm:$0xf] (%p44_p3), %v210_v1  ;;  %v214_v3 = vld [vmem:[%s1323_s29 + $0x18] sm:$0xf] (%p44_p3) }
  0x11   : > { %v216_v4 = vld [vmem:[%s1323_s29 + $0x20] sm:$0xf]  ;;  %213 = vst [vmem:[%s186_s30 + $0x8] sm:$0xf] %v212_v2  ;;  %215 = vst [vmem:[%s186_s30 + $0xc] sm:$0xf] %v214_v3 }
  0x12   : > { %217 = vst [vmem:[%s186_s30 + $0x10] sm:$0xf] %v216_v4  ;;  %v218_v5 = vld [vmem:[%s1323_s29 + $0x28] sm:$0xf]  ;;  %v220_v6 = vld [vmem:[%s1323_s29 + $0x30] sm:$0xf] }
  0x13   : > { %v222_v7 = vld [vmem:[%s1323_s29 + $0x38] sm:$0xf]  ;;  %219 = vst [vmem:[%s186_s30 + $0x14] sm:$0xf] %v218_v5  ;;  %221 = vst [vmem:[%s186_s30 + $0x18] sm:$0xf] %v220_v6 }
  0x14   : > { %223 = vst [vmem:[%s186_s30 + $0x1c] sm:$0xf] %v222_v7  ;;  %v224_v8 = vld [vmem:[%s1323_s29 + $0x40] sm:$0xf]  ;;  %v226_v9 = vld [vmem:[%s1323_s29 + $0x48] sm:$0xf] }
  0x15   : > { %v228_v10 = vld [vmem:[%s1323_s29 + $0x50] sm:$0xf]  ;;  %225 = vst [vmem:[%s186_s30 + $0x20] sm:$0xf] %v224_v8  ;;  %227 = vst [vmem:[%s186_s30 + $0x24] sm:$0xf] %v226_v9 }
  0x16   : > { %229 = vst [vmem:[%s186_s30 + $0x28] sm:$0xf] %v228_v10  ;;  %v230_v11 = vld [vmem:[%s1323_s29 + $0x58] sm:$0xf]  ;;  %v232_v12 = vld [vmem:[%s1323_s29 + $0x60] sm:$0xf] }
  0x17   : > { %v234_v13 = vld [vmem:[%s1323_s29 + $0x68] sm:$0xf]  ;;  %231 = vst [vmem:[%s186_s30 + $0x2c] sm:$0xf] %v230_v11  ;;  %233 = vst [vmem:[%s186_s30 + $0x30] sm:$0xf] %v232_v12 }
  0x18   : > { %235 = vst [vmem:[%s186_s30 + $0x34] sm:$0xf] %v234_v13  ;;  %v236_v14 = vld [vmem:[%s1323_s29 + $0x70] sm:$0xf]  ;;  %v238_v15 = vld [vmem:[%s1323_s29 + $0x78] sm:$0xf] }
  0x19   : > { %237 = vst [vmem:[%s186_s30 + $0x38] sm:$0xf] %v236_v14  ;;  %239 = vst [vmem:[%s186_s30 + $0x3c] sm:$0xf] %v238_v15 }
  0x1a PF: > { %p948_p6 = scmp.ge.s32.totalorder %s1252_s19, 1  ;;  %p303_p7 = scmp.lt.s32.totalorder %s1252_s19, 3 }
  0x1c   : > { %p304_p8 = pnand %p948_p6, %p303_p7 }
  0x1d   : > { %s310_s5 = sand.u32 (!%p304_p8), 1, %s1236_s15   ;;  %s950_s6 = sshll.u32 (!%p304_p8), %s1244_s17, 4 }
  0x1e   : > { %307 = sbr.rel (%p304_p8) target bundleno = 317 (0x13d), region = 73  ;;  %s949_s7 = sshll.u32 (!%p304_p8), %s310_s5, 6 }
  0x1f   : > { %p347_p9 = scmp.lt.s32.totalorder (!%p304_p8), %s950_s6, 31  ;;  %s1350_s12 = scalar_lea.vmem (!%p304_p8), [#allocation3], %s949_s7 }
  0x20   : > { %p952_p10 = scmp.ne.s32.totalorder (!%p304_p8), %s1244_s17, 0 }
  0x23   : > { %s1466_s6 = smov (!%p347_p9, %s950_s6), 31  ;;  %368 = sbr.rel (%p952_p10) target bundleno = 49 (0x31), region = 81 }
  0x24   : > { %s951_s8 = sshll.u32 %s1466_s6, 2 }
  0x25   : > { %s1348_s11 = scalar_lea.vmem %s1455_s1, %s951_s8 }
  0x28   : > { %v1254_v16 = vmov 0.0  }
  0x29   : > { %369 = vst [vmem:[#allocation2 + $0x30] sm:$0xff] %v1254_v16  ;;  %370 = vst [vmem:[#allocation2] sm:$0xff] %v1254_v16 }
  0x2a   : > { %371 = vst [vmem:[#allocation2 + $0x58] sm:$0xff] %v1254_v16  ;;  %372 = vst [vmem:[#allocation2 + $0x18] sm:$0xff] %v1254_v16 }
  0x2b   : > { %373 = vst [vmem:[#allocation2 + $0x50] sm:$0xff] %v1254_v16  ;;  %374 = vst [vmem:[#allocation2 + $0x68] sm:$0xff] %v1254_v16 }
  0x2c   : > { %375 = vst [vmem:[#allocation2 + $0x8] sm:$0xff] %v1254_v16  ;;  %376 = vst [vmem:[#allocation2 + $0x48] sm:$0xff] %v1254_v16 }
  0x2d   : > { %377 = vst [vmem:[#allocation2 + $0x40] sm:$0xff] %v1254_v16  ;;  %378 = vst [vmem:[#allocation2 + $0x20] sm:$0xff] %v1254_v16 }
  0x2e   : > { %379 = vst [vmem:[#allocation2 + $0x10] sm:$0xff] %v1254_v16  ;;  %380 = vst [vmem:[#allocation2 + $0x38] sm:$0xff] %v1254_v16 }
  0x2f   : > { %381 = vst [vmem:[#allocation2 + $0x60] sm:$0xff] %v1254_v16  ;;  %382 = vst [vmem:[#allocation2 + $0x70] sm:$0xff] %v1254_v16 }
  0x30   : > { %383 = vst [vmem:[#allocation2 + $0x78] sm:$0xff] %v1254_v16  ;;  %384 = vst [vmem:[#allocation2 + $0x28] sm:$0xff] %v1254_v16 }
  0x31 PF: > { %v1198_v17 = vld [vmem:[%s1348_s11 + $0x38] sm:$0xff]   ;;  %v1199_v18 = vld [vmem:[%s1348_s11 + $0x30] sm:$0xff]   ;;  %v1200_v19 = vld [vmem:[%s1348_s11 + $0x28] sm:$0xff]   ;;  %p969_p11 = scmp.ne.s32.totalorder %s1244_s17, 1 }
  0x32   : > { %1109 = vmatprep.subr.bf16.mxu0 %v1198_v17  ;;  %1141 = vmatprep.subr.bf16.mxu1 %v1198_v17  ;;  %v1201_v20 = vld [vmem:[%s1348_s11 + $0x20] sm:$0xff]   ;;  %v1202_v23 = vld [vmem:[%s1348_s11 + $0x18] sm:$0xff]   ;;  %v1203_v24 = vld [vmem:[%s1348_s11 + $0x10] sm:$0xff]  }
  0x33   : > { %1110 = vmatpush3.bf16.msra.mxu0 %v1198_v17  ;;  %1149 = vmatpush3.bf16.msra.mxu1 %v1198_v17  ;;  %v1206_v21 = vld [vmem:[%s1350_s12] sm:$0xff]   ;;  %v1204_v25 = vld [vmem:[%s1348_s11 + $0x8] sm:$0xff]   ;;  %v1210_v29 = vld [vmem:[%s1350_s12 + $0x10] sm:$0xff]  }
  0x34   : > { %1111 = vmatprep.subr.bf16.mxu0 %v1199_v18  ;;  %1142 = vmatprep.subr.bf16.mxu1 %v1199_v18  ;;  %v1207_v22 = vld [vmem:[%s1350_s12 + $0x20] sm:$0xff]   ;;  %v1208_v27 = vld [vmem:[%s1350_s12 + $0x8] sm:$0xff]   ;;  %v1211_v30 = vld [vmem:[%s1350_s12 + $0x30] sm:$0xff]  }
  0x35   : > { %1125 = vmatprep.mubr.bf16.mxu0 %v1206_v21  ;;  %1133 = vmatprep.mubr.bf16.mxu1 %v1207_v22  ;;  %v1205_v26 = vld [vmem:[%s1348_s11] sm:$0xff]   ;;  %v1209_v28 = vld [vmem:[%s1350_s12 + $0x28] sm:$0xff]   ;;  %v1212_v31 = vld [vmem:[%s1350_s12 + $0x18] sm:$0xff]  }
  0x36   : > { %v1213_v32 = vld [vmem:[%s1350_s12 + $0x38] sm:$0xff]   ;;  %v395_v34 = vld [vmem:[#allocation2 + $0x10] sm:$0xff]  ;;  %v393_v38 = vld [vmem:[#allocation2 + $0x40] sm:$0xff] }
  0x37   : > { %1112 = vmatpush3.bf16.msra.mxu0 %v1199_v18  ;;  %1150 = vmatpush3.bf16.msra.mxu1 %v1199_v18  ;;  %v387_v33 = vld [vmem:[#allocation2 + $0x58] sm:$0xff]  ;;  %v385_v37 = vld [vmem:[#allocation2 + $0x30] sm:$0xff]  ;;  %v386_v49 = vld [vmem:[#allocation2] sm:$0xff] }
  0x38   : > { %1113 = vmatprep.subr.bf16.mxu0 %v1200_v19  ;;  %1143 = vmatprep.subr.bf16.mxu1 %v1200_v19  ;;  %v388_v43 = vld [vmem:[#allocation2 + $0x18] sm:$0xff]  ;;  %v394_v50 = vld [vmem:[#allocation2 + $0x20] sm:$0xff]  ;;  %v391_v55 = vld [vmem:[#allocation2 + $0x8] sm:$0xff] }
  0x39   : > { %v396_v44 = vld [vmem:[#allocation2 + $0x38] sm:$0xff]  ;;  %v389_v61 = vld [vmem:[#allocation2 + $0x50] sm:$0xff]  ;;  %v397_v62 = vld [vmem:[#allocation2 + $0x60] sm:$0xff] }
  0x3a   : > { %v399_v56 = vld [vmem:[#allocation2 + $0x78] sm:$0xff]  ;;  %v392_v3 = vld [vmem:[#allocation2 + $0x48] sm:$0xff]  ;;  %v398_v10 = vld [vmem:[#allocation2 + $0x70] sm:$0xff] }
  0x3b   : > { %1114 = vmatpush3.bf16.msra.mxu0 %v1200_v19  ;;  %1151 = vmatpush3.bf16.msra.mxu1 %v1200_v19  ;;  %v400_v4 = vld [vmem:[#allocation2 + $0x28] sm:$0xff] }
  0x3c   : > { %1115 = vmatprep.subr.bf16.mxu0 %v1201_v20  ;;  %1144 = vmatprep.subr.bf16.mxu1 %v1201_v20  ;;  %v390_v9 = vld [vmem:[#allocation2 + $0x68] sm:$0xff] }
  0x3f   : > { %1116 = vmatpush3.bf16.msra.mxu0 %v1201_v20  ;;  %1152 = vmatpush3.bf16.msra.mxu1 %v1201_v20 }
  0x40   : > { %1117 = vmatprep.subr.bf16.mxu0 %v1202_v23  ;;  %1145 = vmatprep.subr.bf16.mxu1 %v1202_v23 }
  0x43   : > { %1118 = vmatpush3.bf16.msra.mxu0 %v1202_v23  ;;  %1153 = vmatpush3.bf16.msra.mxu1 %v1202_v23 }
  0x44   : > { %1119 = vmatprep.subr.bf16.mxu0 %v1203_v24  ;;  %1146 = vmatprep.subr.bf16.mxu1 %v1203_v24 }
  0x47   : > { %1120 = vmatpush3.bf16.msra.mxu0 %v1203_v24  ;;  %1154 = vmatpush3.bf16.msra.mxu1 %v1203_v24 }
  0x48   : > { %1121 = vmatprep.subr.bf16.mxu0 %v1204_v25  ;;  %1147 = vmatprep.subr.bf16.mxu1 %v1204_v25 }
  0x4b   : > { %1122 = vmatpush3.bf16.msra.mxu0 %v1204_v25  ;;  %1155 = vmatpush3.bf16.msra.mxu1 %v1204_v25 }
  0x4c   : > { %1123 = vmatprep.subr.bf16.mxu0 %v1205_v26  ;;  %1148 = vmatprep.subr.bf16.mxu1 %v1205_v26 }
  0x4f   : > { %1124 = vmatpush3.bf16.msra.mxu0 %v1205_v26  ;;  %1156 = vmatpush3.bf16.msra.mxu1 %v1205_v26 }
  0x52   : > { %1126 = vmatmul.mubr.bf16.vlgmr.msra.gmra.mxu0 %v1208_v27  ;;  %1134 = vmatmul.mubr.bf16.vlgmr.msra.gmra.mxu1 %v1209_v28 }
  0x53   : > { %1129 = vmatprep.mubr.bf16.mxu0 %v1210_v29  ;;  %1137 = vmatprep.mubr.bf16.mxu1 %v1211_v30 }
  0x5a   : > { %1130 = vmatmul.mubr.bf16.gmra.mxu0 %v1212_v31  ;;  %1138 = vmatmul.mubr.bf16.gmra.mxu1 %v1213_v32 }
 0x112   : > { %v1127_v35 = vpop.f32.mrf.mxu0  ;;  %v1135_v36 = vpop.f32.mrf.mxu1 }
 0x113   : > { %v628_v39 = vadd.f32 %v1127_v35, %v387_v33  ;;  %v636_v40 = vadd.f32 %v1135_v36, %v395_v34 }
 0x114   : > { %v563_v41 = vpop.f32.mrf.mxu0  ;;  %v595_v42 = vpop.f32.mrf.mxu1 }
 0x115   : > { %644 = vst [vmem:[#allocation2 + $0x58] sm:$0xff] %v628_v39  ;;  %652 = vst [vmem:[#allocation2 + $0x10] sm:$0xff] %v636_v40  ;;  %v626_v45 = vadd.f32 %v563_v41, %v385_v37  ;;  %v634_v46 = vadd.f32 %v595_v42, %v393_v38 }
 0x116   : > { %v1128_v47 = vpop.f32.mrf.mxu0  ;;  %v1136_v48 = vpop.f32.mrf.mxu1 }
 0x117   : > { %642 = vst [vmem:[#allocation2 + $0x30] sm:$0xff] %v626_v45  ;;  %650 = vst [vmem:[#allocation2 + $0x40] sm:$0xff] %v634_v46  ;;  %v629_v51 = vadd.f32 %v1128_v47, %v388_v43  ;;  %v637_v52 = vadd.f32 %v1136_v48, %v396_v44 }
 0x118   : > { %v566_v53 = vpop.f32.mrf.mxu0  ;;  %v598_v54 = vpop.f32.mrf.mxu1 }
 0x119   : > { %645 = vst [vmem:[#allocation2 + $0x18] sm:$0xff] %v629_v51  ;;  %653 = vst [vmem:[#allocation2 + $0x38] sm:$0xff] %v637_v52  ;;  %v627_v57 = vadd.f32 %v566_v53, %v386_v49  ;;  %v635_v58 = vadd.f32 %v598_v54, %v394_v50 }
 0x11a   : > { %v1131_v59 = vpop.f32.mrf.mxu0  ;;  %v1139_v60 = vpop.f32.mrf.mxu1 }
 0x11b   : > { %643 = vst [vmem:[#allocation2] sm:$0xff] %v627_v57  ;;  %651 = vst [vmem:[#allocation2 + $0x20] sm:$0xff] %v635_v58  ;;  %v632_v63 = vadd.f32 %v1131_v59, %v391_v55  ;;  %v640_v0 = vadd.f32 %v1139_v60, %v399_v56 }
 0x11c   : > { %v579_v1 = vpop.f32.mrf.mxu0  ;;  %v611_v2 = vpop.f32.mrf.mxu1 }
 0x11d   : > { %648 = vst [vmem:[#allocation2 + $0x8] sm:$0xff] %v632_v63  ;;  %656 = vst [vmem:[#allocation2 + $0x78] sm:$0xff] %v640_v0  ;;  %v630_v5 = vadd.f32 %v579_v1, %v389_v61  ;;  %v638_v6 = vadd.f32 %v611_v2, %v397_v62 }
 0x11e   : > { %v1132_v7 = vpop.f32.mrf.mxu0  ;;  %v1140_v8 = vpop.f32.mrf.mxu1 }
 0x11f   : > { %646 = vst [vmem:[#allocation2 + $0x50] sm:$0xff] %v630_v5  ;;  %654 = vst [vmem:[#allocation2 + $0x60] sm:$0xff] %v638_v6  ;;  %v633_v11 = vadd.f32 %v1132_v7, %v392_v3  ;;  %v641_v12 = vadd.f32 %v1140_v8, %v400_v4  ;;  %661 = sbr.rel (%p969_p11) target bundleno = 317 (0x13d), region = 85 }
 0x120   : > { %v582_v13 = vpop.f32.mrf.mxu0  ;;  %v614_v14 = vpop.f32.mrf.mxu1 }
 0x121   : > { %649 = vst [vmem:[#allocation2 + $0x48] sm:$0xff] %v633_v11  ;;  %657 = vst [vmem:[#allocation2 + $0x28] sm:$0xff] %v641_v12  ;;  %v631_v15 = vadd.f32 %v582_v13, %v390_v9  ;;  %v639_v16 = vadd.f32 %v614_v14, %v398_v10 }
 0x123   : > { %647 = vst [vmem:[#allocation2 + $0x68] sm:$0xff] %v631_v15  ;;  %655 = vst [vmem:[#allocation2 + $0x70] sm:$0xff] %v639_v16 }
 0x124   : > { %v662_v17 = vld [vmem:[#allocation2 + $0x30] sm:$0xff]  ;;  %v663_v18 = vld [vmem:[#allocation2] sm:$0xff]  ;;  %v664_v23 = vld [vmem:[#allocation2 + $0x58] sm:$0xff] }
 0x125   : > { %v1373_v19 = vld [vmem:[%s1456_s2] ss:$0 sm:$0xff]  ;;  %v665_v24 = vld [vmem:[#allocation2 + $0x18] sm:$0xff]  ;;  %v1079_v29 = vld [vmem:[%s1457_s3 + $0x8] sm:$0xff]  }
 0x126   : > { %v685_v20 = vadd.f32 %v1373_v19, %v662_v17  ;;  %v686_v21 = vadd.f32 %v1373_v19, %v663_v18  ;;  %v1008_v22 = vld [vmem:[%s1457_s3] sm:$0xff]   ;;  %v687_v27 = vadd.f32 %v1373_v19, %v664_v23  ;;  %v688_v28 = vadd.f32 %v1373_v19, %v665_v24  ;;  %v666_v30 = vld [vmem:[#allocation2 + $0x50] sm:$0xff]  ;;  %v668_v41 = vld [vmem:[#allocation2 + $0x8] sm:$0xff] }
 0x127   : > { %v1009_v25 = vunpack.c.l.bf16 %v1008_v22  ;;  %v1010_v26 = vunpack.c.h.bf16 %v1008_v22  ;;  %v1013_v34 = vunpack.c.l.bf16 %v1079_v29  ;;  %v1014_v35 = vunpack.c.h.bf16 %v1079_v29  ;;  %v1080_v36 = vld [vmem:[%s1457_s3 + $0x10] sm:$0xff]   ;;  %v1081_v43 = vld [vmem:[%s1457_s3 + $0x18] sm:$0xff]   ;;  %v670_v52 = vld [vmem:[#allocation2 + $0x40] sm:$0xff] }
 0x128   : > { %v701_v32 = vmax.f32 %v685_v20, 0.0  ;;  %v702_v33 = vmax.f32 %v686_v21, 0.0  ;;  %v703_v37 = vmax.f32 %v687_v27, 0.0  ;;  %v704_v38 = vmax.f32 %v688_v28, 0.0  ;;  %v669_v42 = vld [vmem:[#allocation2 + $0x48] sm:$0xff]  ;;  %v671_v53 = vld [vmem:[#allocation2 + $0x20] sm:$0xff] }
 0x129   : > { %v689_v39 = vadd.f32 %v1373_v19, %v666_v30  ;;  %v1017_v46 = vunpack.c.l.bf16 %v1080_v36  ;;  %v1018_v47 = vunpack.c.h.bf16 %v1080_v36  ;;  %v691_v55 = vadd.f32 %v1373_v19, %v668_v41  ;;  %v1082_v58 = vld [vmem:[%s1457_s3 + $0x20] sm:$0xff]   ;;  %v672_v59 = vld [vmem:[#allocation2 + $0x10] sm:$0xff]  ;;  %v673_v4 = vld [vmem:[#allocation2 + $0x38] sm:$0xff] }
 0x12a   : > { %v667_v31 = vld [vmem:[#allocation2 + $0x68] sm:$0xff]  ;;  %v749_v44 = vadd.f32 %v1009_v25, %v701_v32  ;;  %v750_v45 = vadd.f32 %v1010_v26, %v702_v33  ;;  %v751_v48 = vadd.f32 %v1013_v34, %v703_v37  ;;  %v752_v49 = vadd.f32 %v1014_v35, %v704_v38  ;;  %v674_v10 = vld [vmem:[#allocation2 + $0x60] sm:$0xff]  ;;  %v675_v15 = vld [vmem:[#allocation2 + $0x70] sm:$0xff] }
 0x12b   : > { %v690_v40 = vadd.f32 %v1373_v19, %v667_v31  ;;  %v705_v50 = vmax.f32 %v689_v39, 0.0  ;;  %v692_v56 = vadd.f32 %v1373_v19, %v669_v42  ;;  %v1021_v57 = vunpack.c.l.bf16 %v1081_v43  ;;  %v1083_v5 = vld [vmem:[%s1457_s3 + $0x28] sm:$0xff]   ;;  %v1084_v16 = vld [vmem:[%s1457_s3 + $0x30] sm:$0xff]   ;;  %v676_v22 = vld [vmem:[#allocation2 + $0x78] sm:$0xff] }
 0x12c   : > { %v1042_v54 = vpack.c.bf16 %v750_v45, %v749_v44  ;;  %v1047_v60 = vpack.c.bf16 %v752_v49, %v751_v48  ;;  %v1022_v63 = vunpack.c.h.bf16 %v1081_v43  ;;  %v707_v0 = vmax.f32 %v691_v55, 0.0  ;;  %v677_v27 = vld [vmem:[#allocation2 + $0x28] sm:$0xff]  ;;  %v1085_v28 = vld [vmem:[%s1457_s3 + $0x38] sm:$0xff]  }
 0x12d   : > { %v706_v51 = vmax.f32 %v690_v40, 0.0  ;;  %v753_v61 = vadd.f32 %v1017_v46, %v705_v50  ;;  %v708_v1 = vmax.f32 %v692_v56, 0.0  ;;  %v693_v2 = vadd.f32 %v1373_v19, %v670_v52 }
 0x12e   : > { %1043 = vst [vmem:[%s1458_s4] sm:$0xff] %v1042_v54   ;;  %v694_v3 = vadd.f32 %v1373_v19, %v671_v53  ;;  %1086 = vst [vmem:[%s1458_s4 + $0x8] sm:$0xff] %v1047_v60   ;;  %v1025_v7 = vunpack.c.l.bf16 %v1082_v58  ;;  %v1026_v8 = vunpack.c.h.bf16 %v1082_v58  ;;  %v695_v9 = vadd.f32 %v1373_v19, %v672_v59 }
 0x12f   : > { %v754_v62 = vadd.f32 %v1018_v47, %v706_v51  ;;  %v755_v11 = vadd.f32 %v1021_v57, %v707_v0  ;;  %v756_v12 = vadd.f32 %v1022_v63, %v708_v1  ;;  %v709_v13 = vmax.f32 %v693_v2, 0.0 }
 0x130   : > { %v710_v14 = vmax.f32 %v694_v3, 0.0  ;;  %v696_v17 = vadd.f32 %v1373_v19, %v673_v4  ;;  %v711_v18 = vmax.f32 %v695_v9, 0.0  ;;  %v1029_v20 = vunpack.c.l.bf16 %v1083_v5 }
 0x131   : > { %v1052_v6 = vpack.c.bf16 %v754_v62, %v753_v61  ;;  %v1030_v21 = vunpack.c.h.bf16 %v1083_v5  ;;  %v1057_v23 = vpack.c.bf16 %v756_v12, %v755_v11  ;;  %v757_v24 = vadd.f32 %v1025_v7, %v709_v13 }
 0x132   : > { %v758_v25 = vadd.f32 %v1026_v8, %v710_v14  ;;  %v697_v26 = vadd.f32 %v1373_v19, %v674_v10  ;;  %v712_v29 = vmax.f32 %v696_v17, 0.0  ;;  %v759_v30 = vadd.f32 %v1029_v20, %v711_v18 }
 0x133   : > { %1087 = vst [vmem:[%s1458_s4 + $0x10] sm:$0xff] %v1052_v6   ;;  %v698_v31 = vadd.f32 %v1373_v19, %v675_v15  ;;  %v1033_v32 = vunpack.c.l.bf16 %v1084_v16  ;;  %1088 = vst [vmem:[%s1458_s4 + $0x18] sm:$0xff] %v1057_v23   ;;  %v1034_v35 = vunpack.c.h.bf16 %v1084_v16  ;;  %v699_v36 = vadd.f32 %v1373_v19, %v676_v22 }
 0x134   : > { %v1062_v33 = vpack.c.bf16 %v758_v25, %v757_v24  ;;  %v713_v34 = vmax.f32 %v697_v26, 0.0  ;;  %v760_v37 = vadd.f32 %v1030_v21, %v712_v29  ;;  %v700_v39 = vadd.f32 %v1373_v19, %v677_v27 }
 0x135   : > { %v714_v38 = vmax.f32 %v698_v31, 0.0  ;;  %v1037_v40 = vunpack.c.l.bf16 %v1085_v28  ;;  %v715_v42 = vmax.f32 %v699_v36, 0.0  ;;  %v1038_v43 = vunpack.c.h.bf16 %v1085_v28 }
 0x136   : > { %1089 = vst [vmem:[%s1458_s4 + $0x20] sm:$0xff] %v1062_v33   ;;  %v761_v41 = vadd.f32 %v1033_v32, %v713_v34  ;;  %v1067_v44 = vpack.c.bf16 %v760_v37, %v759_v30  ;;  %v716_v46 = vmax.f32 %v700_v39, 0.0 }
 0x137   : > { %v762_v45 = vadd.f32 %v1034_v35, %v714_v38  ;;  %v763_v47 = vadd.f32 %v1037_v40, %v715_v42 }
 0x138   : > { %1090 = vst [vmem:[%s1458_s4 + $0x28] sm:$0xff] %v1067_v44   ;;  %v764_v49 = vadd.f32 %v1038_v43, %v716_v46 }
 0x139   : > { %v1072_v48 = vpack.c.bf16 %v762_v45, %v761_v41 }
 0x13a   : > { %v1077_v19 = vpack.c.bf16 %v764_v49, %v763_v47 }
 0x13b   : > { %1091 = vst [vmem:[%s1458_s4 + $0x30] sm:$0xff] %v1072_v48  }
 0x13c   : > { %1092 = vst [vmem:[%s1458_s4 + $0x38] sm:$0xff] %v1077_v19  }
 0x13d PF: > { %s14_s19 = sadd.s32 1, %s1252_s19   ;;  %s1459_s15 = smov %s1240_s16 }
 0x13e   : > { %p11_p12 = scmp.ge.s32.totalorder %s14_s19, 4   ;;  %s1460_s16 = smov %s1315_s23 }
 0x13f   : > { %s1461_s17 = smov %s1248_s18  ;;  %s1462_s18 = smov %s1464_s20 }
 0x140   :  { %13 = sbr.rel (!%p11_p12) target bundleno = 3 (0x3), region = 126 }

// kernel: head_forward.4
= control target key start
LH: loop header
LB: loop body
LE: loop exit
PB: predicated region body
PF: predicated region fallthrough
CT: control target
= control target key end

     0   :  { %s1912_s15 = smov 0   ;;  %s1914_s16 = smov 0   ;;  %s2178_s0 = inlined_call_operand.vmem [shape: bf16[512,256], index: 0, kind: input, shape index: {}]   ;;  %s2179_s1 = inlined_call_operand.vmem [shape: bf16[256,128], index: 1, kind: input, shape index: {}]   ;;  %s2180_s2 = inlined_call_operand.vmem [shape: f32[1,128], index: 2, kind: input, shape index: {}]   ;;  %s2181_s3 = inlined_call_operand.vmem [shape: bf16[512,128], index: 3, kind: input, shape index: {}]   ;;  %s2182_s4 = inlined_call_operand.vmem [shape: bf16[512,128], index: 4, kind: output, shape index: {}]  }
   0x1   :  { %s1916_s17 = smov 0   ;;  %s1918_s18 = smov 0  }
   0x2   :  { %s1920_s19 = smov 0   ;;  %s1922_s20 = smov 0  }
   0x3   :  { %s1924_s21 = smov 0  }
   0x4 LB: > { %s23_s22 = sadd.s32 1, %s1876_s19  ;;  %s26_s23 = sadd.s32 1, %s1880_s20  ;;  %s1884_s21 = sphi %s1924_s21, %s14_s21   ;;  %s1880_s20 = sphi %s1922_s20, %s2188_s20   ;;  %s1876_s19 = sphi %s1920_s19, %s2187_s19   ;;  %s1872_s18 = sphi %s1918_s18, %s2186_s18   ;;  %s1868_s17 = sphi %s1916_s17, %s2185_s17   ;;  %s1864_s16 = sphi %s1914_s16, %s2184_s16   ;;  %s1860_s15 = sphi %s1912_s15, %s2183_s15  }
   0x5   : > { %p24_p0 = scmp.ge.s32.totalorder %s23_s22, 2  ;;  %p42_p1 = scmp.ne.s32.totalorder %s1864_s16, %s1860_s15 }
   0x6   : > { %p43_p2 = scmp.eq.s32.totalorder %s1884_s21, 0  ;;  %s35_s27 = sadd.s32 1, %s1864_s16 }
   0x7   : > { %s2190_s22 = smov (%p24_p0, %s23_s22), 0  ;;  %s2192_s23 = smov (!%p24_p0, %s26_s23), %s1880_s20 }
   0x8   : > { %p44_p3 = por %p43_p2, %p42_p1  ;;  %p28_p4 = scmp.ge.s32.totalorder %s2192_s23, 2 }
   0x9   : > { %s31_s24 = ssub.s32 %s1876_s19, %s2190_s22  ;;  %p1380_p6 = scmp.ge.s32.totalorder %s1884_s21, 4 }
   0xa   : > { %s2194_s23 = smov (%p28_p4, %s2192_s23), 0 }
   0xb   : > { %s30_s25 = ssub.s32 %s1880_s20, %s2194_s23  ;;  %170 = sbr.rel (%p1380_p6) target bundleno = 43 (0x2b), region = 20 }
   0xc   : > { %s32_s26 = sor.u32 %s31_s24, %s30_s25 }
   0xd   : > { %p33_p5 = scmp.eq.s32.totalorder %s32_s26, 0 }
   0xf   : > { %s1963_s28 = scalar_select %p33_p5, %s1864_s16, %s35_s27  }
  0x10   : > { %173 = sbr.rel (!%p44_p3) target bundleno = 43 (0x2b), region = 24  ;;  %s175_s29 = sand.u32 (%p44_p3), 1, %s1864_s16  }
  0x11   : > { %s1454_s30 = sshll.u32 (%p44_p3), %s1880_s20, 6  ;;  %s1381_s5 = sshll.u32 (%p44_p3), %s175_s29, 7 }
  0x12   : > { %s180_s6 = sadd.s32 (%p44_p3), %s1876_s19, %s1454_s30  ;;  %s1977_s11 = scalar_lea.vmem (%p44_p3), [#allocation3], %s1381_s5 }
  0x13   : > { %s1384_s7 = sshll.u32 (%p44_p3), %s180_s6, 2 }
  0x14   : > { %s1972_s10 = scalar_lea.vmem (%p44_p3), %s2178_s0, %s1384_s7 }
  0x15   : > { %v199_v0 = vld [vmem:[%s1972_s10] sm:$0xf]  ;;  %v201_v1 = vld [vmem:[%s1972_s10 + $0x8] sm:$0xf]  ;;  %v203_v2 = vld [vmem:[%s1972_s10 + $0x10] sm:$0xf] }
  0x16   : > { %200 = vst [vmem:[%s1977_s11] sm:$0xf] %v199_v0  ;;  %202 = vst [vmem:[%s1977_s11 + $0x4] sm:$0xf] %v201_v1  ;;  %v205_v3 = vld [vmem:[%s1972_s10 + $0x18] sm:$0xf] }
  0x17   : > { %204 = vst [vmem:[%s1977_s11 + $0x8] sm:$0xf] %v203_v2  ;;  %v207_v4 = vld [vmem:[%s1972_s10 + $0x20] sm:$0xf]  ;;  %v209_v5 = vld [vmem:[%s1972_s10 + $0x28] sm:$0xf] }
  0x18   : > { %206 = vst [vmem:[%s1977_s11 + $0xc] sm:$0xf] %v205_v3  ;;  %208 = vst [vmem:[%s1977_s11 + $0x10] sm:$0xf] %v207_v4  ;;  %v211_v6 = vld [vmem:[%s1972_s10 + $0x30] sm:$0xf] }
  0x19   : > { %210 = vst [vmem:[%s1977_s11 + $0x14] sm:$0xf] %v209_v5  ;;  %v213_v7 = vld [vmem:[%s1972_s10 + $0x38] sm:$0xf]  ;;  %v215_v8 = vld [vmem:[%s1972_s10 + $0x40] sm:$0xf] }
  0x1a   : > { %212 = vst [vmem:[%s1977_s11 + $0x18] sm:$0xf] %v211_v6  ;;  %214 = vst [vmem:[%s1977_s11 + $0x1c] sm:$0xf] %v213_v7  ;;  %v217_v9 = vld [vmem:[%s1972_s10 + $0x48] sm:$0xf] }
  0x1b   : > { %216 = vst [vmem:[%s1977_s11 + $0x20] sm:$0xf] %v215_v8  ;;  %v219_v10 = vld [vmem:[%s1972_s10 + $0x50] sm:$0xf]  ;;  %v221_v11 = vld [vmem:[%s1972_s10 + $0x58] sm:$0xf] }
  0x1c   : > { %218 = vst [vmem:[%s1977_s11 + $0x24] sm:$0xf] %v217_v9  ;;  %220 = vst [vmem:[%s1977_s11 + $0x28] sm:$0xf] %v219_v10  ;;  %v223_v12 = vld [vmem:[%s1972_s10 + $0x60] sm:$0xf] }
  0x1d   : > { %222 = vst [vmem:[%s1977_s11 + $0x2c] sm:$0xf] %v221_v11  ;;  %v225_v13 = vld [vmem:[%s1972_s10 + $0x68] sm:$0xf]  ;;  %v227_v14 = vld [vmem:[%s1972_s10 + $0x70] sm:$0xf] }
  0x1e   : > { %224 = vst [vmem:[%s1977_s11 + $0x30] sm:$0xf] %v223_v12  ;;  %226 = vst [vmem:[%s1977_s11 + $0x34] sm:$0xf] %v225_v13  ;;  %v229_v15 = vld [vmem:[%s1972_s10 + $0x78] sm:$0xf] }
  0x1f   : > { %228 = vst [vmem:[%s1977_s11 + $0x38] sm:$0xf] %v227_v14  ;;  %v231_v16 = vld [vmem:[%s1972_s10 + $0x80] sm:$0xf]  ;;  %v233_v17 = vld [vmem:[%s1972_s10 + $0x88] sm:$0xf] }
  0x20   : > { %230 = vst [vmem:[%s1977_s11 + $0x3c] sm:$0xf] %v229_v15  ;;  %232 = vst [vmem:[%s1977_s11 + $0x40] sm:$0xf] %v231_v16  ;;  %v235_v18 = vld [vmem:[%s1972_s10 + $0x90] sm:$0xf] }
  0x21   : > { %234 = vst [vmem:[%s1977_s11 + $0x44] sm:$0xf] %v233_v17  ;;  %v237_v19 = vld [vmem:[%s1972_s10 + $0x98] sm:$0xf]  ;;  %v239_v20 = vld [vmem:[%s1972_s10 + $0xa0] sm:$0xf] }
  0x22   : > { %236 = vst [vmem:[%s1977_s11 + $0x48] sm:$0xf] %v235_v18  ;;  %238 = vst [vmem:[%s1977_s11 + $0x4c] sm:$0xf] %v237_v19  ;;  %v241_v21 = vld [vmem:[%s1972_s10 + $0xa8] sm:$0xf] }
  0x23   : > { %240 = vst [vmem:[%s1977_s11 + $0x50] sm:$0xf] %v239_v20  ;;  %v243_v22 = vld [vmem:[%s1972_s10 + $0xb0] sm:$0xf]  ;;  %v245_v23 = vld [vmem:[%s1972_s10 + $0xb8] sm:$0xf] }
  0x24   : > { %242 = vst [vmem:[%s1977_s11 + $0x54] sm:$0xf] %v241_v21  ;;  %244 = vst [vmem:[%s1977_s11 + $0x58] sm:$0xf] %v243_v22  ;;  %v247_v24 = vld [vmem:[%s1972_s10 + $0xc0] sm:$0xf] }
  0x25   : > { %246 = vst [vmem:[%s1977_s11 + $0x5c] sm:$0xf] %v245_v23  ;;  %v249_v25 = vld [vmem:[%s1972_s10 + $0xc8] sm:$0xf]  ;;  %v251_v26 = vld [vmem:[%s1972_s10 + $0xd0] sm:$0xf] }
  0x26   : > { %248 = vst [vmem:[%s1977_s11 + $0x60] sm:$0xf] %v247_v24  ;;  %250 = vst [vmem:[%s1977_s11 + $0x64] sm:$0xf] %v249_v25  ;;  %v253_v27 = vld [vmem:[%s1972_s10 + $0xd8] sm:$0xf] }
  0x27   : > { %252 = vst [vmem:[%s1977_s11 + $0x68] sm:$0xf] %v251_v26  ;;  %v255_v28 = vld [vmem:[%s1972_s10 + $0xe0] sm:$0xf]  ;;  %v257_v29 = vld [vmem:[%s1972_s10 + $0xe8] sm:$0xf] }
  0x28   : > { %254 = vst [vmem:[%s1977_s11 + $0x6c] sm:$0xf] %v253_v27  ;;  %256 = vst [vmem:[%s1977_s11 + $0x70] sm:$0xf] %v255_v28  ;;  %v259_v30 = vld [vmem:[%s1972_s10 + $0xf0] sm:$0xf] }
  0x29   : > { %258 = vst [vmem:[%s1977_s11 + $0x74] sm:$0xf] %v257_v29  ;;  %v261_v31 = vld [vmem:[%s1972_s10 + $0xf8] sm:$0xf]  ;;  %260 = vst [vmem:[%s1977_s11 + $0x78] sm:$0xf] %v259_v30 }
  0x2a   : > { %262 = vst [vmem:[%s1977_s11 + $0x7c] sm:$0xf] %v261_v31 }
  0x2b PF: > { %p1385_p7 = scmp.ge.s32.totalorder %s1884_s21, 1  ;;  %p367_p8 = scmp.lt.s32.totalorder %s1884_s21, 5 }
  0x2d   : > { %p368_p9 = pnand %p1385_p7, %p367_p8 }
  0x2e   : > { %s374_s12 = sand.u32 (!%p368_p9), 1, %s1860_s15   ;;  %s1387_s13 = sshll.u32 (!%p368_p9), %s1868_s17, 4 }
  0x2f   : > { %371 = sbr.rel (%p368_p9) target bundleno = 380 (0x17c), region = 73  ;;  %s1386_s14 = sshll.u32 (!%p368_p9), %s374_s12, 7 }
  0x30   : > { %p411_p10 = scmp.lt.s32.totalorder (!%p368_p9), %s1387_s13, 31  ;;  %s1389_s24 = sshll.u32 (!%p368_p9), %s1872_s18, 5 }
  0x31   : > { %p417_p11 = scmp.lt.s32.totalorder (!%p368_p9), %s1389_s24, 63  ;;  %s2060_s18 = scalar_lea.vmem (!%p368_p9), [#allocation3], %s1386_s14 }
  0x32   : > { %p1393_p12 = scmp.ne.s32.totalorder (!%p368_p9), %s1868_s17, 0 }
  0x34   : > { %s2196_s13 = smov (!%p411_p10, %s1387_s13), 31  ;;  %s2198_s24 = smov (!%p417_p11, %s1389_s24), 63 }
  0x35   : > { %s1388_s25 = sshll.u32 %s2196_s13, 2  ;;  %s1390_s30 = sshll.u32 %s2198_s24, 2 }
  0x36   : > { %s2048_s29 = scalar_lea.vmem %s2179_s1, %s1388_s25  ;;  %s2053_s7 = scalar_lea.vmem %s2181_s3, %s1390_s30 }
  0x37   : > { %s2058_s9 = scalar_lea.vmem %s2182_s4, %s1390_s30  ;;  %432 = sbr.rel (%p1393_p12) target bundleno = 77 (0x4d), region = 81 }
  0x3c   : > { %v1886_v32 = vmov 0.0  }
  0x3d   : > { %433 = vst [vmem:[#allocation2 + $0xb0] sm:$0xff] %v1886_v32  ;;  %434 = vst [vmem:[#allocation2] sm:$0xff] %v1886_v32 }
  0x3e   : > { %435 = vst [vmem:[#allocation2 + $0xd8] sm:$0xff] %v1886_v32  ;;  %436 = vst [vmem:[#allocation2 + $0x18] sm:$0xff] %v1886_v32 }
  0x3f   : > { %437 = vst [vmem:[#allocation2 + $0x50] sm:$0xff] %v1886_v32  ;;  %438 = vst [vmem:[#allocation2 + $0x68] sm:$0xff] %v1886_v32 }
  0x40   : > { %439 = vst [vmem:[#allocation2 + $0x30] sm:$0xff] %v1886_v32  ;;  %440 = vst [vmem:[#allocation2 + $0x48] sm:$0xff] %v1886_v32 }
  0x41   : > { %441 = vst [vmem:[#allocation2 + $0x80] sm:$0xff] %v1886_v32  ;;  %442 = vst [vmem:[#allocation2 + $0x88] sm:$0xff] %v1886_v32 }
  0x42   : > { %443 = vst [vmem:[#allocation2 + $0xe8] sm:$0xff] %v1886_v32  ;;  %444 = vst [vmem:[#allocation2 + $0xb8] sm:$0xff] %v1886_v32 }
  0x43   : > { %445 = vst [vmem:[#allocation2 + $0x60] sm:$0xff] %v1886_v32  ;;  %446 = vst [vmem:[#allocation2 + $0xf0] sm:$0xff] %v1886_v32 }
  0x44   : > { %447 = vst [vmem:[#allocation2 + $0x8] sm:$0xff] %v1886_v32  ;;  %448 = vst [vmem:[#allocation2 + $0x78] sm:$0xff] %v1886_v32 }
  0x45   : > { %449 = vst [vmem:[#allocation2 + $0x38] sm:$0xff] %v1886_v32  ;;  %450 = vst [vmem:[#allocation2 + $0x58] sm:$0xff] %v1886_v32 }
  0x46   : > { %451 = vst [vmem:[#allocation2 + $0x40] sm:$0xff] %v1886_v32  ;;  %452 = vst [vmem:[#allocation2 + $0xc8] sm:$0xff] %v1886_v32 }
  0x47   : > { %453 = vst [vmem:[#allocation2 + $0xe0] sm:$0xff] %v1886_v32  ;;  %454 = vst [vmem:[#allocation2 + $0x90] sm:$0xff] %v1886_v32 }
  0x48   : > { %455 = vst [vmem:[#allocation2 + $0x70] sm:$0xff] %v1886_v32  ;;  %456 = vst [vmem:[#allocation2 + $0xc0] sm:$0xff] %v1886_v32 }
  0x49   : > { %457 = vst [vmem:[#allocation2 + $0xa8] sm:$0xff] %v1886_v32  ;;  %458 = vst [vmem:[#allocation2 + $0xd0] sm:$0xff] %v1886_v32 }
  0x4a   : > { %459 = vst [vmem:[#allocation2 + $0x10] sm:$0xff] %v1886_v32  ;;  %460 = vst [vmem:[#allocation2 + $0x28] sm:$0xff] %v1886_v32 }
  0x4b   : > { %461 = vst [vmem:[#allocation2 + $0xa0] sm:$0xff] %v1886_v32  ;;  %462 = vst [vmem:[#allocation2 + $0xf8] sm:$0xff] %v1886_v32 }
  0x4c   : > { %463 = vst [vmem:[#allocation2 + $0x20] sm:$0xff] %v1886_v32  ;;  %464 = vst [vmem:[#allocation2 + $0x98] sm:$0xff] %v1886_v32 }
  0x4d PF: > { %v1806_v33 = vld [vmem:[%s2048_s29 + $0x38] sm:$0xff]   ;;  %v1807_v34 = vld [vmem:[%s2048_s29 + $0x30] sm:$0xff]   ;;  %v1808_v35 = vld [vmem:[%s2048_s29 + $0x28] sm:$0xff]   ;;  %p1418_p13 = scmp.ne.s32.totalorder %s1868_s17, 1 }
  0x4e   : > { %1685 = vmatprep.subr.bf16.mxu0 %v1806_v33  ;;  %1733 = vmatprep.subr.bf16.mxu1 %v1806_v33  ;;  %v1809_v36 = vld [vmem:[%s2048_s29 + $0x20] sm:$0xff]   ;;  %v1810_v39 = vld [vmem:[%s2048_s29 + $0x18] sm:$0xff]   ;;  %v1811_v40 = vld [vmem:[%s2048_s29 + $0x10] sm:$0xff]  }
  0x4f   : > { %1686 = vmatpush3.bf16.msra.mxu0 %v1806_v33  ;;  %1741 = vmatpush3.bf16.msra.mxu1 %v1806_v33  ;;  %v1814_v37 = vld [vmem:[%s2060_s18] sm:$0xff]   ;;  %v1812_v41 = vld [vmem:[%s2048_s29 + $0x8] sm:$0xff]   ;;  %v1818_v45 = vld [vmem:[%s2060_s18 + $0x10] sm:$0xff]  }
  0x50   : > { %1687 = vmatprep.subr.bf16.mxu0 %v1807_v34  ;;  %1734 = vmatprep.subr.bf16.mxu1 %v1807_v34  ;;  %v1815_v38 = vld [vmem:[%s2060_s18 + $0x40] sm:$0xff]   ;;  %v1816_v43 = vld [vmem:[%s2060_s18 + $0x8] sm:$0xff]   ;;  %v1819_v46 = vld [vmem:[%s2060_s18 + $0x50] sm:$0xff]  }
  0x51   : > { %1701 = vmatprep.mubr.bf16.mxu0 %v1814_v37  ;;  %1717 = vmatprep.mubr.bf16.mxu1 %v1815_v38  ;;  %v1813_v42 = vld [vmem:[%s2048_s29] sm:$0xff]   ;;  %v1817_v44 = vld [vmem:[%s2060_s18 + $0x48] sm:$0xff]   ;;  %v1820_v47 = vld [vmem:[%s2060_s18 + $0x18] sm:$0xff]  }
  0x52   : > { %v1821_v48 = vld [vmem:[%s2060_s18 + $0x58] sm:$0xff]   ;;  %v1822_v49 = vld [vmem:[%s2060_s18 + $0x20] sm:$0xff]   ;;  %v1824_v51 = vld [vmem:[%s2060_s18 + $0x28] sm:$0xff]  }
  0x53   : > { %1688 = vmatpush3.bf16.msra.mxu0 %v1807_v34  ;;  %1742 = vmatpush3.bf16.msra.mxu1 %v1807_v34  ;;  %v1823_v50 = vld [vmem:[%s2060_s18 + $0x60] sm:$0xff]   ;;  %v1825_v52 = vld [vmem:[%s2060_s18 + $0x68] sm:$0xff]   ;;  %v1826_v53 = vld [vmem:[%s2060_s18 + $0x30] sm:$0xff]  }
  0x54   : > { %1689 = vmatprep.subr.bf16.mxu0 %v1808_v35  ;;  %1735 = vmatprep.subr.bf16.mxu1 %v1808_v35  ;;  %v1827_v54 = vld [vmem:[%s2060_s18 + $0x70] sm:$0xff]   ;;  %v1828_v55 = vld [vmem:[%s2060_s18 + $0x38] sm:$0xff]   ;;  %v483_v58 = vld [vmem:[#allocation2 + $0x40] sm:$0xff] }
  0x55   : > { %v1829_v56 = vld [vmem:[%s2060_s18 + $0x78] sm:$0xff]   ;;  %v465_v61 = vld [vmem:[#allocation2 + $0xb0] sm:$0xff]  ;;  %v484_v4 = vld [vmem:[#allocation2 + $0xc8] sm:$0xff] }
  0x56   : > { %v467_v57 = vld [vmem:[#allocation2 + $0xd8] sm:$0xff]  ;;  %v466_v9 = vld [vmem:[#allocation2] sm:$0xff]  ;;  %v471_v15 = vld [vmem:[#allocation2 + $0x30] sm:$0xff] }
  0x57   : > { %1690 = vmatpush3.bf16.msra.mxu0 %v1808_v35  ;;  %1743 = vmatpush3.bf16.msra.mxu1 %v1808_v35  ;;  %v481_v62 = vld [vmem:[#allocation2 + $0x38] sm:$0xff]  ;;  %v487_v16 = vld [vmem:[#allocation2 + $0x70] sm:$0xff]  ;;  %v485_v22 = vld [vmem:[#allocation2 + $0xe0] sm:$0xff] }
  0x58   : > { %1691 = vmatprep.subr.bf16.mxu0 %v1809_v36  ;;  %1736 = vmatprep.subr.bf16.mxu1 %v1809_v36  ;;  %v468_v3 = vld [vmem:[#allocation2 + $0x18] sm:$0xff]  ;;  %v469_v21 = vld [vmem:[#allocation2 + $0x50] sm:$0xff]  ;;  %v472_v27 = vld [vmem:[#allocation2 + $0x48] sm:$0xff] }
  0x59   : > { %v482_v10 = vld [vmem:[#allocation2 + $0x58] sm:$0xff]  ;;  %v488_v28 = vld [vmem:[#allocation2 + $0xc0] sm:$0xff]  ;;  %v470_v33 = vld [vmem:[#allocation2 + $0x68] sm:$0xff] }
  0x5a   : > { %v486_v34 = vld [vmem:[#allocation2 + $0x90] sm:$0xff] }
  0x5b   : > { %1692 = vmatpush3.bf16.msra.mxu0 %v1809_v36  ;;  %1744 = vmatpush3.bf16.msra.mxu1 %v1809_v36 }
  0x5c   : > { %1693 = vmatprep.subr.bf16.mxu0 %v1810_v39  ;;  %1737 = vmatprep.subr.bf16.mxu1 %v1810_v39 }
  0x5f   : > { %1694 = vmatpush3.bf16.msra.mxu0 %v1810_v39  ;;  %1745 = vmatpush3.bf16.msra.mxu1 %v1810_v39  ;;  %v475_v39 = vld [vmem:[#allocation2 + $0xe8] sm:$0xff] }
  0x60   : > { %1695 = vmatprep.subr.bf16.mxu0 %v1811_v40  ;;  %1738 = vmatprep.subr.bf16.mxu1 %v1811_v40 }
  0x63   : > { %1696 = vmatpush3.bf16.msra.mxu0 %v1811_v40  ;;  %1746 = vmatpush3.bf16.msra.mxu1 %v1811_v40  ;;  %v491_v40 = vld [vmem:[#allocation2 + $0x10] sm:$0xff] }
  0x64   : > { %1697 = vmatprep.subr.bf16.mxu0 %v1812_v41  ;;  %1739 = vmatprep.subr.bf16.mxu1 %v1812_v41 }
  0x67   : > { %1698 = vmatpush3.bf16.msra.mxu0 %v1812_v41  ;;  %1747 = vmatpush3.bf16.msra.mxu1 %v1812_v41 }
  0x68   : > { %1699 = vmatprep.subr.bf16.mxu0 %v1813_v42  ;;  %1740 = vmatprep.subr.bf16.mxu1 %v1813_v42 }
  0x6b   : > { %1700 = vmatpush3.bf16.msra.mxu0 %v1813_v42  ;;  %1748 = vmatpush3.bf16.msra.mxu1 %v1813_v42 }
  0x6e   : > { %1702 = vmatmul.mubr.bf16.vlgmr.msra.gmra.mxu0 %v1816_v43  ;;  %1718 = vmatmul.mubr.bf16.vlgmr.msra.gmra.mxu1 %v1817_v44 }
  0x6f   : > { %1705 = vmatprep.mubr.bf16.mxu0 %v1818_v45  ;;  %1721 = vmatprep.mubr.bf16.mxu1 %v1819_v46  ;;  %v473_v45 = vld [vmem:[#allocation2 + $0x80] sm:$0xff]  ;;  %v489_v46 = vld [vmem:[#allocation2 + $0xa8] sm:$0xff] }
  0x76   : > { %1706 = vmatmul.mubr.bf16.gmra.mxu0 %v1820_v47  ;;  %1722 = vmatmul.mubr.bf16.gmra.mxu1 %v1821_v48 }
  0x77   : > { %1709 = vmatprep.mubr.bf16.mxu0 %v1822_v49  ;;  %1725 = vmatprep.mubr.bf16.mxu1 %v1823_v50 }
  0x7e   : > { %1710 = vmatmul.mubr.bf16.gmra.mxu0 %v1824_v51  ;;  %1726 = vmatmul.mubr.bf16.gmra.mxu1 %v1825_v52  ;;  %v476_v51 = vld [vmem:[#allocation2 + $0xb8] sm:$0xff]  ;;  %v492_v52 = vld [vmem:[#allocation2 + $0x28] sm:$0xff] }
  0x7f   : > { %1713 = vmatprep.mubr.bf16.mxu0 %v1826_v53  ;;  %1729 = vmatprep.mubr.bf16.mxu1 %v1827_v54 }
  0x86   : > { %1714 = vmatmul.mubr.bf16.gmra.mxu0 %v1828_v55  ;;  %1730 = vmatmul.mubr.bf16.gmra.mxu1 %v1829_v56 }
 0x12e   : > { %v1703_v59 = vpop.f32.mrf.mxu0  ;;  %v1719_v60 = vpop.f32.mrf.mxu1 }
 0x12f   : > { %v852_v63 = vadd.f32 %v1703_v59, %v467_v57  ;;  %v868_v0 = vadd.f32 %v1719_v60, %v483_v58  ;;  %v474_v57 = vld [vmem:[#allocation2 + $0x88] sm:$0xff]  ;;  %v490_v58 = vld [vmem:[#allocation2 + $0xd0] sm:$0xff] }
 0x130   : > { %v723_v1 = vpop.f32.mrf.mxu0  ;;  %v787_v2 = vpop.f32.mrf.mxu1 }
 0x131   : > { %884 = vst [vmem:[#allocation2 + $0xd8] sm:$0xff] %v852_v63  ;;  %900 = vst [vmem:[#allocation2 + $0x40] sm:$0xff] %v868_v0  ;;  %v850_v5 = vadd.f32 %v723_v1, %v465_v61  ;;  %v866_v6 = vadd.f32 %v787_v2, %v481_v62  ;;  %v479_v63 = vld [vmem:[#allocation2 + $0x8] sm:$0xff]  ;;  %v495_v0 = vld [vmem:[#allocation2 + $0x20] sm:$0xff] }
 0x132   : > { %v1704_v7 = vpop.f32.mrf.mxu0  ;;  %v1720_v8 = vpop.f32.mrf.mxu1 }
 0x133   : > { %882 = vst [vmem:[#allocation2 + $0xb0] sm:$0xff] %v850_v5  ;;  %898 = vst [vmem:[#allocation2 + $0x38] sm:$0xff] %v866_v6  ;;  %v853_v11 = vadd.f32 %v1704_v7, %v468_v3  ;;  %v869_v12 = vadd.f32 %v1720_v8, %v484_v4  ;;  %v477_v5 = vld [vmem:[#allocation2 + $0x60] sm:$0xff] }
 0x134   : > { %v726_v13 = vpop.f32.mrf.mxu0  ;;  %v790_v14 = vpop.f32.mrf.mxu1  ;;  %v493_v6 = vld [vmem:[#allocation2 + $0xa0] sm:$0xff] }
 0x135   : > { %885 = vst [vmem:[#allocation2 + $0x18] sm:$0xff] %v853_v11  ;;  %901 = vst [vmem:[#allocation2 + $0xc8] sm:$0xff] %v869_v12  ;;  %v851_v17 = vadd.f32 %v726_v13, %v466_v9  ;;  %v867_v18 = vadd.f32 %v790_v14, %v482_v10  ;;  %v480_v11 = vld [vmem:[#allocation2 + $0x78] sm:$0xff] }
 0x136   : > { %v1707_v19 = vpop.f32.mrf.mxu0  ;;  %v1723_v20 = vpop.f32.mrf.mxu1  ;;  %v496_v12 = vld [vmem:[#allocation2 + $0x98] sm:$0xff] }
 0x137   : > { %883 = vst [vmem:[#allocation2] sm:$0xff] %v851_v17  ;;  %899 = vst [vmem:[#allocation2 + $0x58] sm:$0xff] %v867_v18  ;;  %v856_v23 = vadd.f32 %v1707_v19, %v471_v15  ;;  %v872_v24 = vadd.f32 %v1723_v20, %v487_v16  ;;  %v478_v17 = vld [vmem:[#allocation2 + $0xf0] sm:$0xff]  ;;  %v494_v18 = vld [vmem:[#allocation2 + $0xf8] sm:$0xff] }
 0x138   : > { %v739_v25 = vpop.f32.mrf.mxu0  ;;  %v803_v26 = vpop.f32.mrf.mxu1 }
 0x139   : > { %888 = vst [vmem:[#allocation2 + $0x30] sm:$0xff] %v856_v23  ;;  %904 = vst [vmem:[#allocation2 + $0x70] sm:$0xff] %v872_v24  ;;  %v854_v29 = vadd.f32 %v739_v25, %v469_v21  ;;  %v870_v30 = vadd.f32 %v803_v26, %v485_v22 }
 0x13a   : > { %v1708_v31 = vpop.f32.mrf.mxu0  ;;  %v1724_v32 = vpop.f32.mrf.mxu1 }
 0x13b   : > { %886 = vst [vmem:[#allocation2 + $0x50] sm:$0xff] %v854_v29  ;;  %902 = vst [vmem:[#allocation2 + $0xe0] sm:$0xff] %v870_v30  ;;  %v857_v35 = vadd.f32 %v1708_v31, %v472_v27  ;;  %v873_v36 = vadd.f32 %v1724_v32, %v488_v28 }
 0x13c   : > { %v742_v37 = vpop.f32.mrf.mxu0  ;;  %v806_v38 = vpop.f32.mrf.mxu1 }
 0x13d   : > { %889 = vst [vmem:[#allocation2 + $0x48] sm:$0xff] %v857_v35  ;;  %905 = vst [vmem:[#allocation2 + $0xc0] sm:$0xff] %v873_v36  ;;  %v855_v41 = vadd.f32 %v742_v37, %v470_v33  ;;  %v871_v42 = vadd.f32 %v806_v38, %v486_v34 }
 0x13e   : > { %v1711_v43 = vpop.f32.mrf.mxu0  ;;  %v1727_v44 = vpop.f32.mrf.mxu1 }
 0x13f   : > { %887 = vst [vmem:[#allocation2 + $0x68] sm:$0xff] %v855_v41  ;;  %903 = vst [vmem:[#allocation2 + $0x90] sm:$0xff] %v871_v42  ;;  %v860_v47 = vadd.f32 %v1711_v43, %v475_v39  ;;  %v876_v48 = vadd.f32 %v1727_v44, %v491_v40 }
 0x140   : > { %v755_v49 = vpop.f32.mrf.mxu0  ;;  %v819_v50 = vpop.f32.mrf.mxu1 }
 0x141   : > { %892 = vst [vmem:[#allocation2 + $0xe8] sm:$0xff] %v860_v47  ;;  %908 = vst [vmem:[#allocation2 + $0x10] sm:$0xff] %v876_v48  ;;  %v858_v53 = vadd.f32 %v755_v49, %v473_v45  ;;  %v874_v54 = vadd.f32 %v819_v50, %v489_v46 }
 0x142   : > { %v1712_v55 = vpop.f32.mrf.mxu0  ;;  %v1728_v56 = vpop.f32.mrf.mxu1 }
 0x143   : > { %890 = vst [vmem:[#allocation2 + $0x80] sm:$0xff] %v858_v53  ;;  %906 = vst [vmem:[#allocation2 + $0xa8] sm:$0xff] %v874_v54  ;;  %v861_v59 = vadd.f32 %v1712_v55, %v476_v51  ;;  %v877_v60 = vadd.f32 %v1728_v56, %v492_v52 }
 0x144   : > { %v758_v61 = vpop.f32.mrf.mxu0  ;;  %v822_v62 = vpop.f32.mrf.mxu1 }
 0x145   : > { %893 = vst [vmem:[#allocation2 + $0xb8] sm:$0xff] %v861_v59  ;;  %909 = vst [vmem:[#allocation2 + $0x28] sm:$0xff] %v877_v60  ;;  %v859_v1 = vadd.f32 %v758_v61, %v474_v57  ;;  %v875_v2 = vadd.f32 %v822_v62, %v490_v58 }
 0x146   : > { %v1715_v3 = vpop.f32.mrf.mxu0  ;;  %v1731_v4 = vpop.f32.mrf.mxu1 }
 0x147   : > { %891 = vst [vmem:[#allocation2 + $0x88] sm:$0xff] %v859_v1  ;;  %907 = vst [vmem:[#allocation2 + $0xd0] sm:$0xff] %v875_v2  ;;  %v864_v7 = vadd.f32 %v1715_v3, %v479_v63  ;;  %v880_v8 = vadd.f32 %v1731_v4, %v495_v0 }
 0x148   : > { %v771_v9 = vpop.f32.mrf.mxu0  ;;  %v835_v10 = vpop.f32.mrf.mxu1 }
 0x149   : > { %896 = vst [vmem:[#allocation2 + $0x8] sm:$0xff] %v864_v7  ;;  %912 = vst [vmem:[#allocation2 + $0x20] sm:$0xff] %v880_v8  ;;  %v862_v13 = vadd.f32 %v771_v9, %v477_v5  ;;  %v878_v14 = vadd.f32 %v835_v10, %v493_v6 }
 0x14a   : > { %v1716_v15 = vpop.f32.mrf.mxu0  ;;  %v1732_v16 = vpop.f32.mrf.mxu1 }
 0x14b   : > { %894 = vst [vmem:[#allocation2 + $0x60] sm:$0xff] %v862_v13  ;;  %910 = vst [vmem:[#allocation2 + $0xa0] sm:$0xff] %v878_v14  ;;  %v865_v19 = vadd.f32 %v1716_v15, %v480_v11  ;;  %v881_v20 = vadd.f32 %v1732_v16, %v496_v12  ;;  %917 = sbr.rel (%p1418_p13) target bundleno = 380 (0x17c), region = 85 }
 0x14c   : > { %v774_v21 = vpop.f32.mrf.mxu0  ;;  %v838_v22 = vpop.f32.mrf.mxu1 }
 0x14d   : > { %897 = vst [vmem:[#allocation2 + $0x78] sm:$0xff] %v865_v19  ;;  %913 = vst [vmem:[#allocation2 + $0x98] sm:$0xff] %v881_v20  ;;  %v863_v23 = vadd.f32 %v774_v21, %v478_v17  ;;  %v879_v24 = vadd.f32 %v838_v22, %v494_v18 }
 0x14f   : > { %895 = vst [vmem:[#allocation2 + $0xf0] sm:$0xff] %v863_v23  ;;  %911 = vst [vmem:[#allocation2 + $0xf8] sm:$0xff] %v879_v24 }
 0x150   : > { %v918_v25 = vld [vmem:[#allocation2 + $0xb0] sm:$0xff]  ;;  %v919_v26 = vld [vmem:[#allocation2] sm:$0xff]  ;;  %v920_v31 = vld [vmem:[#allocation2 + $0xd8] sm:$0xff] }
 0x151   : > { %v2091_v27 = vld [vmem:[%s2180_s2] ss:$0 sm:$0xff]  ;;  %v921_v32 = vld [vmem:[#allocation2 + $0x18] sm:$0xff]  ;;  %v1631_v37 = vld [vmem:[%s2053_s7 + $0x8] sm:$0xff]  }
 0x152   : > { %v957_v28 = vadd.f32 %v2091_v27, %v918_v25  ;;  %v958_v29 = vadd.f32 %v2091_v27, %v919_v26  ;;  %v1488_v30 = vld [vmem:[%s2053_s7] sm:$0xff]   ;;  %v959_v35 = vadd.f32 %v2091_v27, %v920_v31  ;;  %v960_v36 = vadd.f32 %v2091_v27, %v921_v32  ;;  %v922_v38 = vld [vmem:[#allocation2 + $0x50] sm:$0xff]  ;;  %v923_v39 = vld [vmem:[#allocation2 + $0x68] sm:$0xff] }
 0x153   : > { %v1489_v33 = vunpack.c.l.bf16 %v1488_v30  ;;  %v1490_v34 = vunpack.c.h.bf16 %v1488_v30  ;;  %v1493_v42 = vunpack.c.l.bf16 %v1631_v37  ;;  %v1494_v43 = vunpack.c.h.bf16 %v1631_v37  ;;  %v1632_v44 = vld [vmem:[%s2053_s7 + $0x10] sm:$0xff]   ;;  %v925_v50 = vld [vmem:[#allocation2 + $0x48] sm:$0xff]  ;;  %v1633_v51 = vld [vmem:[%s2053_s7 + $0x18] sm:$0xff]  }
 0x154   : > { %v989_v40 = vmax.f32 %v957_v28, 0.0  ;;  %v990_v41 = vmax.f32 %v958_v29, 0.0  ;;  %v991_v45 = vmax.f32 %v959_v35, 0.0  ;;  %v992_v46 = vmax.f32 %v960_v36, 0.0  ;;  %v924_v49 = vld [vmem:[#allocation2 + $0x30] sm:$0xff]  ;;  %v926_v60 = vld [vmem:[#allocation2 + $0x80] sm:$0xff] }
 0x155   : > { %v961_v47 = vadd.f32 %v2091_v27, %v922_v38  ;;  %v962_v48 = vadd.f32 %v2091_v27, %v923_v39  ;;  %v1497_v54 = vunpack.c.l.bf16 %v1632_v44  ;;  %v1498_v55 = vunpack.c.h.bf16 %v1632_v44  ;;  %v927_v61 = vld [vmem:[#allocation2 + $0x88] sm:$0xff]  ;;  %v1634_v2 = vld [vmem:[%s2053_s7 + $0x20] sm:$0xff]   ;;  %v929_v12 = vld [vmem:[#allocation2 + $0xb8] sm:$0xff] }
 0x156   : > { %v1085_v52 = vadd.f32 %v1489_v33, %v989_v40  ;;  %v1086_v53 = vadd.f32 %v1490_v34, %v990_v41  ;;  %v1087_v56 = vadd.f32 %v1493_v42, %v991_v45  ;;  %v1088_v57 = vadd.f32 %v1494_v43, %v992_v46  ;;  %v928_v3 = vld [vmem:[#allocation2 + $0xe8] sm:$0xff]  ;;  %v930_v18 = vld [vmem:[#allocation2 + $0x60] sm:$0xff]  ;;  %v931_v23 = vld [vmem:[#allocation2 + $0xf0] sm:$0xff] }
 0x157   : > { %v993_v58 = vmax.f32 %v961_v47, 0.0  ;;  %v994_v59 = vmax.f32 %v962_v48, 0.0  ;;  %v963_v63 = vadd.f32 %v2091_v27, %v924_v49  ;;  %v964_v0 = vadd.f32 %v2091_v27, %v925_v50  ;;  %v1635_v13 = vld [vmem:[%s2053_s7 + $0x28] sm:$0xff]   ;;  %v1636_v24 = vld [vmem:[%s2053_s7 + $0x30] sm:$0xff]   ;;  %v933_v35 = vld [vmem:[#allocation2 + $0x78] sm:$0xff] }
 0x158   : > { %v1554_v62 = vpack.c.bf16 %v1086_v53, %v1085_v52  ;;  %v1501_v1 = vunpack.c.l.bf16 %v1633_v51  ;;  %v1559_v4 = vpack.c.bf16 %v1088_v57, %v1087_v56  ;;  %v1502_v7 = vunpack.c.h.bf16 %v1633_v51  ;;  %v932_v30 = vld [vmem:[#allocation2 + $0x8] sm:$0xff]  ;;  %v1637_v36 = vld [vmem:[%s2053_s7 + $0x38] sm:$0xff]   ;;  %v1638_v51 = vld [vmem:[%s2053_s7 + $0x40] sm:$0xff]  }
 0x159   : > { %v1089_v5 = vadd.f32 %v1497_v54, %v993_v58  ;;  %v1090_v6 = vadd.f32 %v1498_v55, %v994_v59  ;;  %v995_v8 = vmax.f32 %v963_v63, 0.0  ;;  %v996_v9 = vmax.f32 %v964_v0, 0.0  ;;  %v934_v41 = vld [vmem:[#allocation2 + $0x38] sm:$0xff]  ;;  %v936_v56 = vld [vmem:[#allocation2 + $0x40] sm:$0xff] }
 0x15a   : > { %1555 = vst [vmem:[%s2058_s9] sm:$0xff] %v1554_v62   ;;  %v965_v10 = vadd.f32 %v2091_v27, %v926_v60  ;;  %v966_v11 = vadd.f32 %v2091_v27, %v927_v61  ;;  %1646 = vst [vmem:[%s2058_s9 + $0x8] sm:$0xff] %v1559_v4   ;;  %v1505_v15 = vunpack.c.l.bf16 %v1634_v2  ;;  %v1506_v16 = vunpack.c.h.bf16 %v1634_v2  ;;  %v935_v46 = vld [vmem:[#allocation2 + $0x58] sm:$0xff]  ;;  %v937_v61 = vld [vmem:[#allocation2 + $0xc8] sm:$0xff] }
 0x15b   : > { %v1564_v14 = vpack.c.bf16 %v1090_v6, %v1089_v5  ;;  %v967_v17 = vadd.f32 %v2091_v27, %v928_v3  ;;  %v1091_v19 = vadd.f32 %v1501_v1, %v995_v8  ;;  %v1092_v20 = vadd.f32 %v1502_v7, %v996_v9  ;;  %v1639_v62 = vld [vmem:[%s2053_s7 + $0x48] sm:$0xff]   ;;  %v938_v3 = vld [vmem:[#allocation2 + $0xe0] sm:$0xff]  ;;  %v939_v8 = vld [vmem:[#allocation2 + $0x90] sm:$0xff] }
 0x15c   : > { %v997_v21 = vmax.f32 %v965_v10, 0.0  ;;  %v998_v22 = vmax.f32 %v966_v11, 0.0  ;;  %v968_v25 = vadd.f32 %v2091_v27, %v929_v12  ;;  %v1509_v28 = vunpack.c.l.bf16 %v1635_v13  ;;  %v1640_v9 = vld [vmem:[%s2053_s7 + $0x50] sm:$0xff]  }
 0x15d   : > { %1647 = vst [vmem:[%s2058_s9 + $0x10] sm:$0xff] %v1564_v14   ;;  %v999_v26 = vmax.f32 %v967_v17, 0.0  ;;  %v1510_v29 = vunpack.c.h.bf16 %v1635_v13  ;;  %v1569_v31 = vpack.c.bf16 %v1092_v20, %v1091_v19  ;;  %v969_v34 = vadd.f32 %v2091_v27, %v930_v18  ;;  %v940_v14 = vld [vmem:[#allocation2 + $0x70] sm:$0xff]  ;;  %v941_v19 = vld [vmem:[#allocation2 + $0xc0] sm:$0xff]  ;;  %v1641_v20 = vld [vmem:[%s2053_s7 + $0x58] sm:$0xff]  }
 0x15e   : > { %v1093_v32 = vadd.f32 %v1505_v15, %v997_v21  ;;  %v1094_v33 = vadd.f32 %v1506_v16, %v998_v22  ;;  %v1000_v37 = vmax.f32 %v968_v25, 0.0  ;;  %v970_v39 = vadd.f32 %v2091_v27, %v931_v23  ;;  %v942_v25 = vld [vmem:[#allocation2 + $0xa8] sm:$0xff] }
 0x15f   : > { %v1095_v38 = vadd.f32 %v1509_v28, %v999_v26  ;;  %v1513_v40 = vunpack.c.l.bf16 %v1636_v24  ;;  %1648 = vst [vmem:[%s2058_s9 + $0x18] sm:$0xff] %v1569_v31   ;;  %v1001_v43 = vmax.f32 %v969_v34, 0.0  ;;  %v1514_v44 = vunpack.c.h.bf16 %v1636_v24  ;;  %v943_v31 = vld [vmem:[#allocation2 + $0xd0] sm:$0xff] }
 0x160   : > { %v1574_v42 = vpack.c.bf16 %v1094_v33, %v1093_v32  ;;  %v971_v45 = vadd.f32 %v2091_v27, %v932_v30  ;;  %v1096_v47 = vadd.f32 %v1510_v29, %v1000_v37  ;;  %v1002_v48 = vmax.f32 %v970_v39, 0.0 }
 0x161   : > { %v972_v49 = vadd.f32 %v2091_v27, %v933_v35  ;;  %v1517_v50 = vunpack.c.l.bf16 %v1637_v36  ;;  %v1097_v52 = vadd.f32 %v1513_v40, %v1001_v43  ;;  %v1518_v54 = vunpack.c.h.bf16 %v1637_v36  ;;  %v1642_v36 = vld [vmem:[%s2053_s7 + $0x60] sm:$0xff]  }
 0x162   : > { %1649 = vst [vmem:[%s2058_s9 + $0x20] sm:$0xff] %v1574_v42   ;;  %v1003_v53 = vmax.f32 %v971_v45, 0.0  ;;  %v973_v55 = vadd.f32 %v2091_v27, %v934_v41  ;;  %v1579_v57 = vpack.c.bf16 %v1096_v47, %v1095_v38  ;;  %v1098_v58 = vadd.f32 %v1514_v44, %v1002_v48  ;;  %v944_v41 = vld [vmem:[#allocation2 + $0x10] sm:$0xff]  ;;  %v1643_v47 = vld [vmem:[%s2053_s7 + $0x68] sm:$0xff]  }
 0x163   : > { %v1004_v59 = vmax.f32 %v972_v49, 0.0  ;;  %v974_v60 = vadd.f32 %v2091_v27, %v935_v46  ;;  %v1521_v1 = vunpack.c.l.bf16 %v1638_v51  ;;  %v1522_v2 = vunpack.c.h.bf16 %v1638_v51  ;;  %v945_v46 = vld [vmem:[#allocation2 + $0x28] sm:$0xff] }
 0x164   : > { %v1099_v63 = vadd.f32 %v1517_v50, %v1003_v53  ;;  %v1005_v0 = vmax.f32 %v973_v55, 0.0  ;;  %1650 = vst [vmem:[%s2058_s9 + $0x28] sm:$0xff] %v1579_v57   ;;  %v1584_v4 = vpack.c.bf16 %v1098_v58, %v1097_v52  ;;  %v975_v7 = vadd.f32 %v2091_v27, %v936_v56  ;;  %v946_v52 = vld [vmem:[#allocation2 + $0xa0] sm:$0xff]  ;;  %v947_v57 = vld [vmem:[#allocation2 + $0xf8] sm:$0xff]  ;;  %v1644_v58 = vld [vmem:[%s2053_s7 + $0x70] sm:$0xff]  }
 0x165   : > { %v1100_v5 = vadd.f32 %v1518_v54, %v1004_v59  ;;  %v1006_v6 = vmax.f32 %v974_v60, 0.0  ;;  %v976_v11 = vadd.f32 %v2091_v27, %v937_v61  ;;  %v1525_v12 = vunpack.c.l.bf16 %v1639_v62 }
 0x166   : > { %v1101_v10 = vadd.f32 %v1521_v1, %v1005_v0  ;;  %v1526_v13 = vunpack.c.h.bf16 %v1639_v62  ;;  %1651 = vst [vmem:[%s2058_s9 + $0x30] sm:$0xff] %v1584_v4   ;;  %v1007_v17 = vmax.f32 %v975_v7, 0.0  ;;  %v977_v18 = vadd.f32 %v2091_v27, %v938_v3  ;;  %v949_v4 = vld [vmem:[#allocation2 + $0x98] sm:$0xff] }
 0x167   : > { %v1589_v15 = vpack.c.bf16 %v1100_v5, %v1099_v63  ;;  %v1102_v16 = vadd.f32 %v1522_v2, %v1006_v6  ;;  %v1008_v21 = vmax.f32 %v976_v11, 0.0  ;;  %v978_v22 = vadd.f32 %v2091_v27, %v939_v8  ;;  %v948_v63 = vld [vmem:[#allocation2 + $0x20] sm:$0xff]  ;;  %v1645_v5 = vld [vmem:[%s2053_s7 + $0x78] sm:$0xff]  }
 0x168   : > { %v1529_v23 = vunpack.c.l.bf16 %v1640_v9  ;;  %v1530_v24 = vunpack.c.h.bf16 %v1640_v9  ;;  %v1103_v28 = vadd.f32 %v1525_v12, %v1007_v17  ;;  %v1009_v29 = vmax.f32 %v977_v18, 0.0 }
 0x169   : > { %1652 = vst [vmem:[%s2058_s9 + $0x38] sm:$0xff] %v1589_v15   ;;  %v1594_v26 = vpack.c.bf16 %v1102_v16, %v1101_v10  ;;  %v979_v30 = vadd.f32 %v2091_v27, %v940_v14  ;;  %v1104_v32 = vadd.f32 %v1526_v13, %v1008_v21  ;;  %v1010_v33 = vmax.f32 %v978_v22, 0.0 }
 0x16a   : > { %v980_v34 = vadd.f32 %v2091_v27, %v941_v19  ;;  %v1533_v35 = vunpack.c.l.bf16 %v1641_v20  ;;  %v1105_v37 = vadd.f32 %v1529_v23, %v1009_v29  ;;  %v1534_v39 = vunpack.c.h.bf16 %v1641_v20 }
 0x16b   : > { %1653 = vst [vmem:[%s2058_s9 + $0x40] sm:$0xff] %v1594_v26   ;;  %v1011_v38 = vmax.f32 %v979_v30, 0.0  ;;  %v981_v40 = vadd.f32 %v2091_v27, %v942_v25  ;;  %v1599_v42 = vpack.c.bf16 %v1104_v32, %v1103_v28  ;;  %v1106_v43 = vadd.f32 %v1530_v24, %v1010_v33 }
 0x16c   : > { %v1012_v44 = vmax.f32 %v980_v34, 0.0  ;;  %v982_v45 = vadd.f32 %v2091_v27, %v943_v31  ;;  %v1537_v50 = vunpack.c.l.bf16 %v1642_v36  ;;  %v1538_v51 = vunpack.c.h.bf16 %v1642_v36 }
 0x16d   : > { %v1107_v48 = vadd.f32 %v1533_v35, %v1011_v38  ;;  %v1013_v49 = vmax.f32 %v981_v40, 0.0  ;;  %1654 = vst [vmem:[%s2058_s9 + $0x48] sm:$0xff] %v1599_v42   ;;  %v1604_v53 = vpack.c.bf16 %v1106_v43, %v1105_v37  ;;  %v983_v56 = vadd.f32 %v2091_v27, %v944_v41 }
 0x16e   : > { %v1108_v54 = vadd.f32 %v1534_v39, %v1012_v44  ;;  %v1014_v55 = vmax.f32 %v982_v45, 0.0  ;;  %v984_v60 = vadd.f32 %v2091_v27, %v945_v46  ;;  %v1541_v61 = vunpack.c.l.bf16 %v1643_v47 }
 0x16f   : > { %v1109_v59 = vadd.f32 %v1537_v50, %v1013_v49  ;;  %v1542_v62 = vunpack.c.h.bf16 %v1643_v47  ;;  %1655 = vst [vmem:[%s2058_s9 + $0x50] sm:$0xff] %v1604_v53   ;;  %v1015_v2 = vmax.f32 %v983_v56, 0.0  ;;  %v985_v3 = vadd.f32 %v2091_v27, %v946_v52 }
 0x170   : > { %v1609_v0 = vpack.c.bf16 %v1108_v54, %v1107_v48  ;;  %v1110_v1 = vadd.f32 %v1538_v51, %v1014_v55  ;;  %v1016_v6 = vmax.f32 %v984_v60, 0.0  ;;  %v986_v7 = vadd.f32 %v2091_v27, %v947_v57 }
 0x171   : > { %v1545_v8 = vunpack.c.l.bf16 %v1644_v58  ;;  %v1546_v9 = vunpack.c.h.bf16 %v1644_v58  ;;  %v1111_v11 = vadd.f32 %v1541_v61, %v1015_v2  ;;  %v1017_v12 = vmax.f32 %v985_v3, 0.0 }
 0x172   : > { %1656 = vst [vmem:[%s2058_s9 + $0x58] sm:$0xff] %v1609_v0   ;;  %v1614_v10 = vpack.c.bf16 %v1110_v1, %v1109_v59  ;;  %v987_v13 = vadd.f32 %v2091_v27, %v948_v63  ;;  %v1112_v14 = vadd.f32 %v1542_v62, %v1016_v6  ;;  %v1018_v15 = vmax.f32 %v986_v7, 0.0 }
 0x173   : > { %v988_v16 = vadd.f32 %v2091_v27, %v949_v4  ;;  %v1549_v17 = vunpack.c.l.bf16 %v1645_v5  ;;  %v1113_v18 = vadd.f32 %v1545_v8, %v1017_v12  ;;  %v1550_v20 = vunpack.c.h.bf16 %v1645_v5 }
 0x174   : > { %1657 = vst [vmem:[%s2058_s9 + $0x60] sm:$0xff] %v1614_v10   ;;  %v1019_v19 = vmax.f32 %v987_v13, 0.0  ;;  %v1619_v21 = vpack.c.bf16 %v1112_v14, %v1111_v11  ;;  %v1114_v22 = vadd.f32 %v1546_v9, %v1018_v15 }
 0x175   : > { %v1020_v23 = vmax.f32 %v988_v16, 0.0 }
 0x176   : > { %v1115_v24 = vadd.f32 %v1549_v17, %v1019_v19  ;;  %1658 = vst [vmem:[%s2058_s9 + $0x68] sm:$0xff] %v1619_v21   ;;  %v1624_v25 = vpack.c.bf16 %v1114_v22, %v1113_v18 }
 0x177   : > { %v1116_v26 = vadd.f32 %v1550_v20, %v1020_v23 }
 0x178   : > { %1659 = vst [vmem:[%s2058_s9 + $0x70] sm:$0xff] %v1624_v25  }
 0x179   : > { %v1629_v28 = vpack.c.bf16 %v1116_v26, %v1115_v24 }
 0x17b   : > { %1660 = vst [vmem:[%s2058_s9 + $0x78] sm:$0xff] %v1629_v28  }
 0x17c PF: > { %s14_s21 = sadd.s32 1, %s1884_s21   ;;  %s2183_s15 = smov %s1864_s16 }
 0x17d   : > { %p11_p0 = scmp.ge.s32.totalorder %s14_s21, 6   ;;  %s2184_s16 = smov %s1963_s28 }
 0x17e   : > { %s2185_s17 = smov %s1876_s19  ;;  %s2186_s18 = smov %s1880_s20 }
 0x17f   : > { %s2187_s19 = smov %s2190_s22  ;;  %s2188_s20 = smov %s2194_s23 }
 0x180   :  { %13 = sbr.rel (!%p11_p0) target bundleno = 4 (0x4), region = 126 }

// kernel: head_forward.5
= control target key start
LH: loop header
LB: loop body
LE: loop exit
PB: predicated region body
PF: predicated region fallthrough
CT: control target
= control target key end

     0   :  { %s1725_s18 = smov 0   ;;  %s1727_s19 = smov 0   ;;  %s1966_s0 = inlined_call_operand.vmem [shape: bf16[576,384], index: 0, kind: input, shape index: {}]   ;;  %s1967_s1 = inlined_call_operand.vmem [shape: bf16[3,384,32], index: 1, kind: input, shape index: {}]   ;;  %s1968_s2 = inlined_call_operand.vmem [shape: f32[1,32], index: 2, kind: input, shape index: {}]   ;;  %s1969_s3 = inlined_call_operand.vmem [shape: bf16[32,128], index: 3, kind: input, shape index: {}]   ;;  %s1970_s4 = inlined_call_operand.vmem [shape: f32[1,128], index: 4, kind: input, shape index: {}]   ;;  %s1971_s5 = inlined_call_operand.vmem [shape: f32[512,128], index: 5, kind: output, shape index: {}]  }
   0x1   :  { %s1729_s20 = smov 0   ;;  %s1731_s21 = smov 0  }
   0x2   :  { %s1733_s22 = smov 0   ;;  %s1735_s23 = smov 0  }
   0x3   :  { %s1737_s24 = smov 0  }
   0x4 LB: > { %s27_s25 = sadd.s32 1, %s1680_s21  ;;  %s30_s26 = sadd.s32 1, %s1684_s22  ;;  %s1692_s24 = sphi %s1737_s24, %s15_s24   ;;  %s1688_s23 = sphi %s1735_s23, %s1977_s23   ;;  %s1684_s22 = sphi %s1733_s22, %s1976_s22   ;;  %s1680_s21 = sphi %s1731_s21, %s1975_s21   ;;  %s1676_s20 = sphi %s1729_s20, %s1974_s20   ;;  %s1672_s19 = sphi %s1727_s19, %s1973_s19   ;;  %s1668_s18 = sphi %s1725_s18, %s1972_s18  }
   0x5   : > { %p28_p0 = scmp.ge.s32.totalorder %s27_s25, 3  ;;  %p1297_p1 = scmp.ge.s32.totalorder %s1692_s24, 1 }
   0x6   : > { %p186_p2 = scmp.lt.s32.totalorder %s1692_s24, 13  ;;  %s34_s27 = sadd.s32 1, %s1688_s23 }
   0x7   : > { %s1979_s25 = smov (%p28_p0, %s27_s25), 0  ;;  %s1981_s26 = smov (!%p28_p0, %s30_s26), %s1684_s22 }
   0x8   : > { %p187_p3 = pnand %p1297_p1, %p186_p2  ;;  %p32_p4 = scmp.ge.s32.totalorder %s1981_s26, 2 }
   0x9   : > { %p214_p6 = scmp.lt.s32.totalorder (!%p187_p3), %s1668_s18, 2  ;;  %s1299_s28 = sshll.u32 (!%p187_p3), %s1676_s20, 1 }
   0xa   : > { %s1983_s26 = smov (%p32_p4, %s1981_s26), 0  ;;  %s1985_s27 = smov (!%p32_p4, %s34_s27), %s1688_s23 }
   0xb   : > { %p36_p5 = scmp.ge.s32.totalorder %s1985_s27, 2  ;;  %190 = sbr.rel (%p187_p3) target bundleno = 570 (0x23a), region = 36 }
   0xc   : > { %s220_s29 = sadd.s32 (!%p187_p3), %s1672_s19, %s1299_s28  ;;  %p1302_p8 = scmp.ne.s32.totalorder (!%p187_p3), %s1668_s18, 0 }
   0xd   : > { %s1987_s27 = smov (%p36_p5, %s1985_s27), 0  ;;  %s1300_s6 = sshll.u32 (!%p187_p3), %s220_s29, 4 }
   0xe   : > { %p222_p7 = scmp.lt.s32.totalorder (!%p187_p3), %s1300_s6, 63 }
  0x10   : > { %s215_s30 = scalar_select %p214_p6, %s1668_s18, 2 }
  0x11   : > { %s1989_s6 = smov (!%p222_p7, %s1300_s6), 63  ;;  %233 = sbr.rel (%p1302_p8) target bundleno = 54 (0x36), region = 40 }
  0x12   : > { %s1520_s7 = smul.u32 192, %s215_s30  ;;  %s1301_s11 = sshll.u32 %s1989_s6, 3 }
  0x13   : > { %s1785_s14 = scalar_lea.vmem %s1971_s5, %s1301_s11  ;;  %s234_s15 = smul.u32 (!%p1302_p8), 18, %s1676_s20 }
  0x14   : > { %s1780_s10 = scalar_lea.vmem %s1967_s1, %s1520_s7  ;;  %s1303_s16 = sshll.u32 (!%p1302_p8), %s1672_s19, 3 }
  0x15   : > { %s236_s17 = sadd.s32 (!%p1302_p8), %s1303_s16, %s234_s15 }
  0x16   : > { %s1304_s28 = sshll.u32 %s236_s17, 4 }
  0x17   : > { %s238_s29 = sshra.s32 %s1304_s28, 3 }
  0x18   : > { %s1372_s30 = smul.u32 12, %s238_s29 }
  0x1a   : > { %s1793_s6 = scalar_lea.vmem %s1966_s0, %s1372_s30 }
  0x1b   : > { %v276_v0 = vld [vmem:[%s1793_s6] sm:$0xff]  ;;  %v278_v1 = vld [vmem:[%s1793_s6 + $0x8] sm:$0xff]  ;;  %v280_v2 = vld [vmem:[%s1793_s6 + $0x10] sm:$0xff] }
  0x1c   : > { %277 = vst [vmem:[#allocation2] sm:$0xff] %v276_v0  ;;  %279 = vst [vmem:[#allocation2 + $0x8] sm:$0xff] %v278_v1  ;;  %v282_v3 = vld [vmem:[%s1793_s6 + $0x18] sm:$0xff]  ;;  %v284_v4 = vld [vmem:[%s1793_s6 + $0x20] sm:$0xff] }
  0x1d   : > { %281 = vst [vmem:[#allocation2 + $0x10] sm:$0xff] %v280_v2  ;;  %v286_v5 = vld [vmem:[%s1793_s6 + $0x28] sm:$0xff]  ;;  %283 = vst [vmem:[#allocation2 + $0x18] sm:$0xff] %v282_v3  ;;  %v288_v6 = vld [vmem:[%s1793_s6 + $0x30] sm:$0xff] }
  0x1e   : > { %285 = vst [vmem:[#allocation2 + $0x20] sm:$0xff] %v284_v4  ;;  %287 = vst [vmem:[#allocation2 + $0x28] sm:$0xff] %v286_v5  ;;  %v290_v7 = vld [vmem:[%s1793_s6 + $0x38] sm:$0xff]  ;;  %v292_v8 = vld [vmem:[%s1793_s6 + $0x40] sm:$0xff] }
  0x1f   : > { %289 = vst [vmem:[#allocation2 + $0x30] sm:$0xff] %v288_v6  ;;  %291 = vst [vmem:[#allocation2 + $0x38] sm:$0xff] %v290_v7  ;;  %v294_v9 = vld [vmem:[%s1793_s6 + $0x48] sm:$0xff]  ;;  %v296_v10 = vld [vmem:[%s1793_s6 + $0x50] sm:$0xff] }
  0x20   : > { %293 = vst [vmem:[#allocation2 + $0x40] sm:$0xff] %v292_v8  ;;  %v298_v11 = vld [vmem:[%s1793_s6 + $0x58] sm:$0xff]  ;;  %295 = vst [vmem:[#allocation2 + $0x48] sm:$0xff] %v294_v9  ;;  %v300_v12 = vld [vmem:[%s1793_s6 + $0x60] sm:$0xff] }
  0x21   : > { %297 = vst [vmem:[#allocation2 + $0x50] sm:$0xff] %v296_v10  ;;  %299 = vst [vmem:[#allocation2 + $0x58] sm:$0xff] %v298_v11  ;;  %v302_v13 = vld [vmem:[%s1793_s6 + $0x68] sm:$0xff]  ;;  %v304_v14 = vld [vmem:[%s1793_s6 + $0x70] sm:$0xff] }
  0x22   : > { %301 = vst [vmem:[#allocation2 + $0x60] sm:$0xff] %v300_v12  ;;  %303 = vst [vmem:[#allocation2 + $0x68] sm:$0xff] %v302_v13  ;;  %v306_v15 = vld [vmem:[%s1793_s6 + $0x78] sm:$0xff]  ;;  %v308_v16 = vld [vmem:[%s1793_s6 + $0x80] sm:$0xff] }
  0x23   : > { %305 = vst [vmem:[#allocation2 + $0x70] sm:$0xff] %v304_v14  ;;  %v310_v17 = vld [vmem:[%s1793_s6 + $0x88] sm:$0xff]  ;;  %307 = vst [vmem:[#allocation2 + $0x78] sm:$0xff] %v306_v15  ;;  %v312_v18 = vld [vmem:[%s1793_s6 + $0x90] sm:$0xff] }
  0x24   : > { %309 = vst [vmem:[#allocation2 + $0x80] sm:$0xff] %v308_v16  ;;  %311 = vst [vmem:[#allocation2 + $0x88] sm:$0xff] %v310_v17  ;;  %v314_v19 = vld [vmem:[%s1793_s6 + $0x98] sm:$0xff]  ;;  %v316_v20 = vld [vmem:[%s1793_s6 + $0xa0] sm:$0xff] }
  0x25   : > { %313 = vst [vmem:[#allocation2 + $0x90] sm:$0xff] %v312_v18  ;;  %315 = vst [vmem:[#allocation2 + $0x98] sm:$0xff] %v314_v19  ;;  %v318_v21 = vld [vmem:[%s1793_s6 + $0xa8] sm:$0xff]  ;;  %v320_v22 = vld [vmem:[%s1793_s6 + $0xb0] sm:$0xff] }
  0x26   : > { %317 = vst [vmem:[#allocation2 + $0xa0] sm:$0xff] %v316_v20  ;;  %v322_v23 = vld [vmem:[%s1793_s6 + $0xb8] sm:$0xff]  ;;  %319 = vst [vmem:[#allocation2 + $0xa8] sm:$0xff] %v318_v21  ;;  %v324_v24 = vld [vmem:[%s1793_s6 + $0xc0] sm:$0xff] }
  0x27   : > { %321 = vst [vmem:[#allocation2 + $0xb0] sm:$0xff] %v320_v22  ;;  %323 = vst [vmem:[#allocation2 + $0xb8] sm:$0xff] %v322_v23  ;;  %v326_v25 = vld [vmem:[%s1793_s6 + $0xc8] sm:$0xff]  ;;  %v328_v26 = vld [vmem:[%s1793_s6 + $0xd0] sm:$0xff] }
  0x28   : > { %325 = vst [vmem:[#allocation2 + $0xc0] sm:$0xff] %v324_v24  ;;  %327 = vst [vmem:[#allocation2 + $0xc8] sm:$0xff] %v326_v25  ;;  %v330_v27 = vld [vmem:[%s1793_s6 + $0xd8] sm:$0xff]  ;;  %v332_v28 = vld [vmem:[%s1793_s6 + $0xe0] sm:$0xff] }
  0x29   : > { %329 = vst [vmem:[#allocation2 + $0xd0] sm:$0xff] %v328_v26  ;;  %v334_v29 = vld [vmem:[%s1793_s6 + $0xe8] sm:$0xff]  ;;  %331 = vst [vmem:[#allocation2 + $0xd8] sm:$0xff] %v330_v27 }
  0x2a   : > { %333 = vst [vmem:[#allocation2 + $0xe0] sm:$0xff] %v332_v28  ;;  %335 = vst [vmem:[#allocation2 + $0xe8] sm:$0xff] %v334_v29 }
  0x2b   : > { %343 = vsyncadd [#allocation4], 3840 }
  0x2c   : > { %1664 = dma.done.wait [#allocation4], 3840 }
  0x2d   : > { %1665 = vsyncadd [#allocation4], 4294963456  ;;  %vm348_vm0 = vcmask 261120   ;;  %v1694_v30 = vmov 0.0  }
  0x2e   : > { %349 = vst.msk [vmem:[#allocation3] sm:$0xff] %vm348_vm0, %v1694_v30  ;;  %350 = vst.msk [vmem:[#allocation3 + $0x8] sm:$0xff] %vm348_vm0, %v1694_v30 }
  0x2f   : > { %351 = vst.msk [vmem:[#allocation3 + $0x10] sm:$0xff] %vm348_vm0, %v1694_v30  ;;  %352 = vst.msk [vmem:[#allocation3 + $0x18] sm:$0xff] %vm348_vm0, %v1694_v30 }
  0x30   : > { %353 = vst.msk [vmem:[#allocation3 + $0x20] sm:$0xff] %vm348_vm0, %v1694_v30  ;;  %354 = vst.msk [vmem:[#allocation3 + $0x28] sm:$0xff] %vm348_vm0, %v1694_v30 }
  0x31   : > { %355 = vst.msk [vmem:[#allocation3 + $0x30] sm:$0xff] %vm348_vm0, %v1694_v30  ;;  %356 = vst.msk [vmem:[#allocation3 + $0x38] sm:$0xff] %vm348_vm0, %v1694_v30 }
  0x32   : > { %357 = vst.msk [vmem:[#allocation3 + $0x40] sm:$0xff] %vm348_vm0, %v1694_v30  ;;  %358 = vst.msk [vmem:[#allocation3 + $0x48] sm:$0xff] %vm348_vm0, %v1694_v30 }
  0x33   : > { %359 = vst.msk [vmem:[#allocation3 + $0x50] sm:$0xff] %vm348_vm0, %v1694_v30  ;;  %360 = vst.msk [vmem:[#allocation3 + $0x58] sm:$0xff] %vm348_vm0, %v1694_v30 }
  0x34   : > { %361 = vst.msk [vmem:[#allocation3 + $0x60] sm:$0xff] %vm348_vm0, %v1694_v30  ;;  %362 = vst.msk [vmem:[#allocation3 + $0x68] sm:$0xff] %vm348_vm0, %v1694_v30 }
  0x35   : > { %363 = vst.msk [vmem:[#allocation3 + $0x70] sm:$0xff] %vm348_vm0, %v1694_v30  ;;  %364 = vst.msk [vmem:[#allocation3 + $0x78] sm:$0xff] %vm348_vm0, %v1694_v30 }
  0x36 PF: > { %v1578_v31 = vld [vmem:[%s1780_s10 + $0x78] sm:$0xff]   ;;  %v1581_v34 = vld [vmem:[%s1780_s10 + $0x70] sm:$0xff]   ;;  %v1584_v37 = vld [vmem:[%s1780_s10 + $0x68] sm:$0xff]   ;;  %s1306_s19 = sshll.u32 %s1668_s18, 4  ;;  %vm949_vm1 = vcmask 261120   ;;  %p1356_p9 = scmp.ne.s32.totalorder %s1668_s18, 2 }
  0x37   : > { %v1579_v32 = vld [vmem:[%s1780_s10 + $0x38] sm:$0xff]   ;;  %1374 = vmatprep.subr.bf16.mxu0 %v1578_v31  ;;  %v1582_v35 = vld [vmem:[%s1780_s10 + $0x30] sm:$0xff]   ;;  %v1585_v38 = vld [vmem:[%s1780_s10 + $0x28] sm:$0xff]   ;;  %s366_s20 = sshra.s32 %s1306_s19, 3 }
  0x38   : > { %v1580_v33 = vld [vmem:[%s1780_s10 + $0xb8] sm:$0xff]   ;;  %1375 = vmatpush3.bf16.msra.mxu0 %v1579_v32  ;;  %v1583_v36 = vld [vmem:[%s1780_s10 + $0xb0] sm:$0xff]   ;;  %v1586_v39 = vld [vmem:[%s1780_s10 + $0xa8] sm:$0xff]   ;;  %s1373_s9 = smul.u32 12, %s366_s20 }
  0x39   : > { %1464 = vmatprep.subr.bf16.mxu1 %v1580_v33  ;;  %1376 = vmatprep.subr.bf16.mxu0 %v1581_v34  ;;  %v1587_v40 = vld [vmem:[%s1780_s10 + $0x60] sm:$0xff]   ;;  %v1590_v43 = vld [vmem:[%s1780_s10 + $0x58] sm:$0xff]   ;;  %v1593_v46 = vld [vmem:[%s1780_s10 + $0x50] sm:$0xff]  }
  0x3a   : > { %1465 = vmatpush3.bf16.msra.mxu1 %v1580_v33  ;;  %v1588_v41 = vld [vmem:[%s1780_s10 + $0x20] sm:$0xff]   ;;  %v1592_v44 = vld [vmem:[%s1780_s10 + $0x98] sm:$0xff]   ;;  %v1595_v47 = vld [vmem:[%s1780_s10 + $0x90] sm:$0xff]   ;;  %s1865_s11 = scalar_lea.vmem [#allocation2], %s1373_s9 }
  0x3b   : > { %1466 = vmatprep.subr.bf16.mxu1 %v1583_v36  ;;  %v1589_v42 = vld [vmem:[%s1780_s10 + $0xa0] sm:$0xff]   ;;  %v1591_v45 = vld [vmem:[%s1780_s10 + $0x18] sm:$0xff]   ;;  %v1594_v48 = vld [vmem:[%s1780_s10 + $0x10] sm:$0xff]  }
  0x3c   : > { %1377 = vmatpush3.bf16.msra.mxu0 %v1582_v35  ;;  %v1596_v49 = vld [vmem:[%s1780_s10 + $0x48] sm:$0xff]   ;;  %v1599_v52 = vld [vmem:[%s1780_s10 + $0x40] sm:$0xff]   ;;  %v1614_v63 = vld [vmem:[%s1865_s11 + $0x50] ss:$12 sps:$4 sm:$0xff]  }
  0x3d   : > { %1378 = vmatprep.subr.bf16.mxu0 %v1584_v37  ;;  %v1597_v50 = vld [vmem:[%s1780_s10 + $0x8] sm:$0xff]   ;;  %v1601_v53 = vld [vmem:[%s1780_s10 + $0x80] sm:$0xff]   ;;  %v1612_v1 = vld [vmem:[%s1865_s11 + $0x30] ss:$12 sps:$4 sm:$0xff]  }
  0x3e   : > { %1467 = vmatpush3.bf16.msra.mxu1 %v1583_v36  ;;  %v1598_v51 = vld [vmem:[%s1780_s10 + $0x88] sm:$0xff]   ;;  %v1604_v54 = vld [vmem:[%s1865_s11 + $0x4] ss:$12 sps:$4 sm:$0xff]   ;;  %v1610_v62 = vld [vmem:[%s1865_s11 + $0x34] ss:$12 sps:$4 sm:$0xff]  }
  0x3f   : > { %1468 = vmatprep.subr.bf16.mxu1 %v1586_v39  ;;  %v1605_v55 = vld [vmem:[%s1865_s11 + $0x8] ss:$12 sps:$4 sm:$0xff]   ;;  %v1600_v56 = vld [vmem:[%s1780_s10] sm:$0xff]   ;;  %771 = vmatprep.mubr.bf16.mxu0 %v1604_v54  ;;  %v1615_v2 = vld [vmem:[%s1865_s11 + $0x4c] ss:$12 sps:$4 sm:$0xff]  }
  0x40   : > { %1379 = vmatpush3.bf16.msra.mxu0 %v1585_v38  ;;  %1480 = vmatprep.mubr.bf16.mxu1 %v1605_v55  ;;  %v1602_v57 = vld [vmem:[%s1865_s11] ss:$12 sps:$4 sm:$0xff]   ;;  %v1607_v58 = vld [vmem:[%s1865_s11 + $0x1c] ss:$12 sps:$4 sm:$0xff]   ;;  %v1613_v60 = vld [vmem:[%s1865_s11 + $0x38] ss:$12 sps:$4 sm:$0xff]  }
  0x41   : > { %1380 = vmatprep.subr.bf16.mxu0 %v1587_v40  ;;  %v1606_v59 = vld [vmem:[%s1865_s11 + $0x20] ss:$12 sps:$4 sm:$0xff]   ;;  %v1609_v61 = vld [vmem:[%s1865_s11 + $0x18] ss:$12 sps:$4 sm:$0xff]   ;;  %v1621_v0 = vld [vmem:[%s1865_s11 + $0x68] ss:$12 sps:$4 sm:$0xff]  }
  0x42   : > { %1469 = vmatpush3.bf16.msra.mxu1 %v1586_v39  ;;  %v1622_v3 = vld [vmem:[%s1865_s11 + $0x80] ss:$12 sps:$4 sm:$0xff]   ;;  %v1629_v4 = vld [vmem:[%s1865_s11 + $0x98] ss:$12 sps:$4 sm:$0xff]   ;;  %v1617_v5 = vld [vmem:[%s1865_s11 + $0x48] ss:$12 sps:$4 sm:$0xff]  }
  0x43   : > { %1470 = vmatprep.subr.bf16.mxu1 %v1589_v42  ;;  %v1618_v6 = vld [vmem:[%s1865_s11 + $0x64] ss:$12 sps:$4 sm:$0xff]   ;;  %v1620_v8 = vld [vmem:[%s1865_s11 + $0x60] ss:$12 sps:$4 sm:$0xff]   ;;  %v1623_v9 = vld [vmem:[%s1865_s11 + $0x7c] ss:$12 sps:$4 sm:$0xff]  }
  0x44   : > { %1381 = vmatpush3.bf16.msra.mxu0 %v1588_v41  ;;  %v1630_v7 = vld [vmem:[%s1865_s11 + $0xb0] ss:$12 sps:$4 sm:$0xff]   ;;  %v1625_v10 = vld [vmem:[%s1865_s11 + $0x78] ss:$12 sps:$4 sm:$0xff]   ;;  %v1626_v11 = vld [vmem:[%s1865_s11 + $0x94] ss:$12 sps:$4 sm:$0xff]  }
  0x45   : > { %1382 = vmatprep.subr.bf16.mxu0 %v1590_v43  ;;  %v1628_v12 = vld [vmem:[%s1865_s11 + $0x90] ss:$12 sps:$4 sm:$0xff]   ;;  %v1631_v13 = vld [vmem:[%s1865_s11 + $0xac] ss:$12 sps:$4 sm:$0xff]   ;;  %v1633_v14 = vld [vmem:[%s1865_s11 + $0xa8] ss:$12 sps:$4 sm:$0xff]  }
  0x46   : > { %1471 = vmatpush3.bf16.msra.mxu1 %v1589_v42  ;;  %v403_v20 = vld [vmem:[#allocation3] sm:$0xff]  ;;  %v404_v28 = vld [vmem:[#allocation3 + $0x8] sm:$0xff]  ;;  %v405_v35 = vld [vmem:[#allocation3 + $0x10] sm:$0xff] }
  0x47   : > { %1472 = vmatprep.subr.bf16.mxu1 %v1592_v44  ;;  %v406_v42 = vld [vmem:[#allocation3 + $0x18] sm:$0xff] }
  0x48   : > { %1383 = vmatpush3.bf16.msra.mxu0 %v1591_v45 }
  0x49   : > { %1384 = vmatprep.subr.bf16.mxu0 %v1593_v46 }
  0x4a   : > { %1473 = vmatpush3.bf16.msra.mxu1 %v1592_v44 }
  0x4b   : > { %1474 = vmatprep.subr.bf16.mxu1 %v1595_v47 }
  0x4c   : > { %1385 = vmatpush3.bf16.msra.mxu0 %v1594_v48 }
  0x4d   : > { %1386 = vmatprep.subr.bf16.mxu0 %v1596_v49 }
  0x4e   : > { %1475 = vmatpush3.bf16.msra.mxu1 %v1595_v47 }
  0x4f   : > { %1476 = vmatprep.subr.bf16.mxu1 %v1598_v51 }
  0x50   : > { %1387 = vmatpush3.bf16.msra.mxu0 %v1597_v50  ;;  %v407_v50 = vld [vmem:[#allocation3 + $0x20] sm:$0xff] }
  0x51   : > { %1388 = vmatprep.subr.bf16.mxu0 %v1599_v52 }
  0x52   : > { %1477 = vmatpush3.bf16.msra.mxu1 %v1598_v51 }
  0x53   : > { %1478 = vmatprep.subr.bf16.mxu1 %v1601_v53 }
  0x54   : > { %1389 = vmatpush3.bf16.msra.mxu0 %v1600_v56 }
  0x56   : > { %1479 = vmatpush3.bf16.msra.mxu1 %v1601_v53 }
  0x57   : > { %772 = vmatmul.mubr.bf16.vlgmr.msra.gmra.mxu0 %v1602_v57  ;;  %v408_v57 = vld [vmem:[#allocation3 + $0x28] sm:$0xff] }
  0x58   : > { %779 = vmatprep.mubr.bf16.mxu0 %v1607_v58 }
  0x59   : > { %1481 = vmatmul.mubr.bf16.vlgmr.msra.gmra.mxu1 %v1606_v59 }
  0x5a   : > { %1484 = vmatprep.mubr.bf16.mxu1 %v1613_v60 }
  0x5f   : > { %780 = vmatmul.mubr.bf16.gmra.mxu0 %v1609_v61 }
  0x60   : > { %787 = vmatprep.mubr.bf16.mxu0 %v1610_v62 }
  0x61   : > { %1485 = vmatmul.mubr.bf16.gmra.mxu1 %v1614_v63  ;;  %v409_v63 = vld [vmem:[#allocation3 + $0x30] sm:$0xff] }
  0x62   : > { %1488 = vmatprep.mubr.bf16.mxu1 %v1621_v0 }
  0x67   : > { %788 = vmatmul.mubr.bf16.gmra.mxu0 %v1612_v1 }
  0x68   : > { %795 = vmatprep.mubr.bf16.mxu0 %v1615_v2 }
  0x69   : > { %1489 = vmatmul.mubr.bf16.gmra.mxu1 %v1622_v3 }
  0x6a   : > { %1492 = vmatprep.mubr.bf16.mxu1 %v1629_v4 }
  0x6f   : > { %796 = vmatmul.mubr.bf16.gmra.mxu0 %v1617_v5 }
  0x70   : > { %803 = vmatprep.mubr.bf16.mxu0 %v1618_v6  ;;  %v410_v6 = vld [vmem:[#allocation3 + $0x38] sm:$0xff] }
  0x71   : > { %1493 = vmatmul.mubr.bf16.gmra.mxu1 %v1630_v7 }
  0x77   : > { %804 = vmatmul.mubr.bf16.gmra.mxu0 %v1620_v8 }
  0x78   : > { %811 = vmatprep.mubr.bf16.mxu0 %v1623_v9 }
  0x7f   : > { %812 = vmatmul.mubr.bf16.gmra.mxu0 %v1625_v10 }
  0x80   : > { %819 = vmatprep.mubr.bf16.mxu0 %v1626_v11 }
  0x87   : > { %820 = vmatmul.mubr.bf16.gmra.mxu0 %v1628_v12 }
  0x88   : > { %827 = vmatprep.mubr.bf16.mxu0 %v1631_v13 }
  0x8f   : > { %828 = vmatmul.mubr.bf16.gmra.mxu0 %v1633_v14  ;;  %v411_v14 = vld [vmem:[#allocation3 + $0x40] sm:$0xff] }
 0x117   : > { %v1390_v15 = vpop.f32.mrf.mxu0 }
 0x119   : > { %v1391_v16 = vpop.f32.mrf.mxu0  ;;  %v1482_v17 = vpop.f32.mrf.mxu1 }
 0x11a   : > { %v1392_v18 = vadd.f32 %v1391_v16, %v1390_v15 }
 0x11b   : > { %v1393_v19 = vpop.f32.mrf.mxu0  ;;  %v870_v21 = vpop.f32.mrf.mxu1 }
 0x11c   : > { %v871_v22 = vadd.f32 %v1392_v18, %v870_v21  ;;  %v412_v21 = vld [vmem:[#allocation3 + $0x48] sm:$0xff] }
 0x11d   : > { %v1394_v23 = vpop.f32.mrf.mxu0  ;;  %v1483_v24 = vpop.f32.mrf.mxu1 }
 0x11e   : > { %v933_v25 = vadd.f32 %v871_v22, %v403_v20  ;;  %v1395_v26 = vadd.f32 %v1394_v23, %v1393_v19 }
 0x11f   : > { %v1396_v27 = vpop.f32.mrf.mxu0  ;;  %v873_v29 = vpop.f32.mrf.mxu1 }
 0x120   : > { %950 = vst.msk [vmem:[#allocation3] sm:$0xff] %vm949_vm1, %v933_v25  ;;  %v874_v30 = vadd.f32 %v1395_v26, %v873_v29 }
 0x121   : > { %v1397_v31 = vpop.f32.mrf.mxu0  ;;  %v1486_v32 = vpop.f32.mrf.mxu1 }
 0x122   : > { %v934_v33 = vadd.f32 %v874_v30, %v404_v28  ;;  %v1398_v34 = vadd.f32 %v1397_v31, %v1396_v27  ;;  %v413_v27 = vld [vmem:[#allocation3 + $0x50] sm:$0xff] }
 0x123   : > { %v1399_v36 = vpop.f32.mrf.mxu0  ;;  %v886_v39 = vpop.f32.mrf.mxu1 }
 0x124   : > { %951 = vst.msk [vmem:[#allocation3 + $0x8] sm:$0xff] %vm949_vm1, %v934_v33  ;;  %v879_v37 = vadd.f32 %v1482_v17, %v1398_v34  ;;  %v414_v34 = vld [vmem:[#allocation3 + $0x58] sm:$0xff] }
 0x125   : > { %v1400_v38 = vpop.f32.mrf.mxu0  ;;  %v1487_v46 = vpop.f32.mrf.mxu1 }
 0x126   : > { %v935_v40 = vadd.f32 %v879_v37, %v405_v35  ;;  %v1401_v41 = vadd.f32 %v1400_v38, %v1399_v36 }
 0x127   : > { %v1402_v43 = vpop.f32.mrf.mxu0  ;;  %v889_v53 = vpop.f32.mrf.mxu1 }
 0x128   : > { %952 = vst.msk [vmem:[#allocation3 + $0x10] sm:$0xff] %vm949_vm1, %v935_v40  ;;  %v882_v44 = vadd.f32 %v1483_v24, %v1401_v41 }
 0x129   : > { %v1403_v45 = vpop.f32.mrf.mxu0  ;;  %v1490_v60 = vpop.f32.mrf.mxu1 }
 0x12a   : > { %v936_v47 = vadd.f32 %v882_v44, %v406_v42  ;;  %v1404_v48 = vadd.f32 %v1403_v45, %v1402_v43  ;;  %v415_v42 = vld [vmem:[#allocation3 + $0x60] sm:$0xff] }
 0x12b   : > { %v1405_v49 = vpop.f32.mrf.mxu0  ;;  %v902_v3 = vpop.f32.mrf.mxu1 }
 0x12c   : > { %953 = vst.msk [vmem:[#allocation3 + $0x18] sm:$0xff] %vm949_vm1, %v936_v47  ;;  %v887_v51 = vadd.f32 %v1404_v48, %v886_v39 }
 0x12d   : > { %v1406_v52 = vpop.f32.mrf.mxu0  ;;  %v1491_v10 = vpop.f32.mrf.mxu1 }
 0x12e   : > { %v937_v54 = vadd.f32 %v887_v51, %v407_v50  ;;  %v1407_v55 = vadd.f32 %v1406_v52, %v1405_v49  ;;  %v416_v49 = vld [vmem:[#allocation3 + $0x68] sm:$0xff] }
 0x12f   : > { %v1408_v56 = vpop.f32.mrf.mxu0  ;;  %v905_v17 = vpop.f32.mrf.mxu1 }
 0x130   : > { %954 = vst.msk [vmem:[#allocation3 + $0x20] sm:$0xff] %vm949_vm1, %v937_v54  ;;  %v890_v58 = vadd.f32 %v1407_v55, %v889_v53  ;;  %v417_v54 = vld [vmem:[#allocation3 + $0x70] sm:$0xff] }
 0x131   : > { %v1409_v59 = vpop.f32.mrf.mxu0  ;;  %v1494_v24 = vpop.f32.mrf.mxu1 }
 0x132   : > { %v938_v61 = vadd.f32 %v890_v58, %v408_v57  ;;  %v1410_v62 = vadd.f32 %v1409_v59, %v1408_v56 }
 0x133   : > { %v1411_v0 = vpop.f32.mrf.mxu0  ;;  %v918_v31 = vpop.f32.mrf.mxu1 }
 0x134   : > { %955 = vst.msk [vmem:[#allocation3 + $0x28] sm:$0xff] %vm949_vm1, %v938_v61  ;;  %v895_v1 = vadd.f32 %v1486_v32, %v1410_v62 }
 0x135   : > { %v1412_v2 = vpop.f32.mrf.mxu0  ;;  %v1495_v38 = vpop.f32.mrf.mxu1 }
 0x136   : > { %v939_v4 = vadd.f32 %v895_v1, %v409_v63  ;;  %v1413_v5 = vadd.f32 %v1412_v2, %v1411_v0 }
 0x137   : > { %v1414_v7 = vpop.f32.mrf.mxu0  ;;  %v921_v45 = vpop.f32.mrf.mxu1 }
 0x138   : > { %956 = vst.msk [vmem:[#allocation3 + $0x30] sm:$0xff] %vm949_vm1, %v939_v4  ;;  %v898_v8 = vadd.f32 %v1487_v46, %v1413_v5 }
 0x139   : > { %v1415_v9 = vpop.f32.mrf.mxu0 }
 0x13a   : > { %v940_v11 = vadd.f32 %v898_v8, %v410_v6  ;;  %v1416_v12 = vadd.f32 %v1415_v9, %v1414_v7 }
 0x13b   : > { %v1417_v13 = vpop.f32.mrf.mxu0 }
 0x13c   : > { %957 = vst.msk [vmem:[#allocation3 + $0x38] sm:$0xff] %vm949_vm1, %v940_v11  ;;  %v903_v15 = vadd.f32 %v1416_v12, %v902_v3 }
 0x13d   : > { %v1418_v16 = vpop.f32.mrf.mxu0 }
 0x13e   : > { %v941_v18 = vadd.f32 %v903_v15, %v411_v14  ;;  %v1419_v19 = vadd.f32 %v1418_v16, %v1417_v13 }
 0x13f   : > { %v1420_v20 = vpop.f32.mrf.mxu0 }
 0x140   : > { %958 = vst.msk [vmem:[#allocation3 + $0x40] sm:$0xff] %vm949_vm1, %v941_v18  ;;  %v906_v22 = vadd.f32 %v1419_v19, %v905_v17 }
 0x141   : > { %v1421_v23 = vpop.f32.mrf.mxu0 }
 0x142   : > { %v942_v25 = vadd.f32 %v906_v22, %v412_v21  ;;  %v1422_v26 = vadd.f32 %v1421_v23, %v1420_v20 }
 0x143   : > { %v1423_v28 = vpop.f32.mrf.mxu0 }
 0x144   : > { %959 = vst.msk [vmem:[#allocation3 + $0x48] sm:$0xff] %vm949_vm1, %v942_v25  ;;  %v911_v29 = vadd.f32 %v1490_v60, %v1422_v26  ;;  %v418_v60 = vld [vmem:[#allocation3 + $0x78] sm:$0xff] }
 0x145   : > { %v1424_v30 = vpop.f32.mrf.mxu0 }
 0x146   : > { %v943_v32 = vadd.f32 %v911_v29, %v413_v27  ;;  %v1425_v33 = vadd.f32 %v1424_v30, %v1423_v28 }
 0x147   : > { %v1426_v35 = vpop.f32.mrf.mxu0 }
 0x148   : > { %960 = vst.msk [vmem:[#allocation3 + $0x50] sm:$0xff] %vm949_vm1, %v943_v32  ;;  %v914_v36 = vadd.f32 %v1491_v10, %v1425_v33 }
 0x149   : > { %v1427_v37 = vpop.f32.mrf.mxu0 }
 0x14a   : > { %v944_v39 = vadd.f32 %v914_v36, %v414_v34  ;;  %v1428_v40 = vadd.f32 %v1427_v37, %v1426_v35 }
 0x14b   : > { %v1429_v41 = vpop.f32.mrf.mxu0 }
 0x14c   : > { %961 = vst.msk [vmem:[#allocation3 + $0x58] sm:$0xff] %vm949_vm1, %v944_v39  ;;  %v919_v43 = vadd.f32 %v1428_v40, %v918_v31 }
 0x14d   : > { %v1430_v44 = vpop.f32.mrf.mxu0 }
 0x14e   : > { %v945_v46 = vadd.f32 %v919_v43, %v415_v42  ;;  %v1431_v47 = vadd.f32 %v1430_v44, %v1429_v41 }
 0x14f   : > { %v1432_v48 = vpop.f32.mrf.mxu0 }
 0x150   : > { %962 = vst.msk [vmem:[#allocation3 + $0x60] sm:$0xff] %vm949_vm1, %v945_v46  ;;  %v922_v50 = vadd.f32 %v1431_v47, %v921_v45 }
 0x151   : > { %v1433_v51 = vpop.f32.mrf.mxu0 }
 0x152   : > { %v946_v52 = vadd.f32 %v922_v50, %v416_v49  ;;  %v1434_v53 = vadd.f32 %v1433_v51, %v1432_v48 }
 0x153   : > { %v1435_v55 = vpop.f32.mrf.mxu0 }
 0x154   : > { %963 = vst.msk [vmem:[#allocation3 + $0x68] sm:$0xff] %vm949_vm1, %v946_v52  ;;  %v927_v56 = vadd.f32 %v1494_v24, %v1434_v53 }
 0x155   : > { %v1436_v57 = vpop.f32.mrf.mxu0 }
 0x156   : > { %v947_v58 = vadd.f32 %v927_v56, %v417_v54  ;;  %v1437_v59 = vadd.f32 %v1436_v57, %v1435_v55 }
 0x158   : > { %964 = vst.msk [vmem:[#allocation3 + $0x70] sm:$0xff] %vm949_vm1, %v947_v58  ;;  %v930_v61 = vadd.f32 %v1495_v38, %v1437_v59  ;;  %969 = sbr.rel (%p1356_p9) target bundleno = 570 (0x23a), region = 78 }
 0x15a   : > { %v948_v62 = vadd.f32 %v930_v61, %v418_v60 }
 0x15c   : > { %965 = vst.msk [vmem:[#allocation3 + $0x78] sm:$0xff] %vm949_vm1, %v948_v62 }
 0x15d   : > { %v1634_v63 = vld [vmem:[%s1969_s3 + $0x8] sm:$0xff]   ;;  %v1635_v0 = vld [vmem:[%s1969_s3] sm:$0xff]   ;;  %v970_v1 = vld [vmem:[#allocation3] sm:$0xff] }
 0x15e   : > { %1496 = vmatprep.subr.bf16.mxu0 %v1634_v63  ;;  %1516 = vmatprep.subr.bf16.mxu1 %v1634_v63  ;;  %v971_v2 = vld [vmem:[#allocation3 + $0x8] sm:$0xff]  ;;  %v1357_v3 = vld [vmem:[%s1968_s2] ss:$0 sm:$0xff]  ;;  %v978_v6 = vld [vmem:[#allocation3 + $0x40] sm:$0xff] }
 0x15f   : > { %1497 = vmatpush3.bf16.msra.mxu0 %v1634_v63  ;;  %1518 = vmatpush3.bf16.msra.mxu1 %v1634_v63  ;;  %v993_v4 = vadd.f32 %v1357_v3, %v970_v1  ;;  %v994_v5 = vadd.f32 %v1357_v3, %v971_v2  ;;  %v979_v7 = vld [vmem:[#allocation3 + $0x48] sm:$0xff]  ;;  %v972_v8 = vld [vmem:[#allocation3 + $0x10] sm:$0xff]  ;;  %v1001_v9 = vadd.f32 %v1357_v3, %v978_v6  ;;  %v973_v11 = vld [vmem:[#allocation3 + $0x18] sm:$0xff] }
 0x160   : > { %1498 = vmatprep.subr.bf16.mxu0 %v1635_v0  ;;  %1517 = vmatprep.subr.bf16.mxu1 %v1635_v0  ;;  %v1002_v10 = vadd.f32 %v1357_v3, %v979_v7  ;;  %v995_v12 = vadd.f32 %v1357_v3, %v972_v8  ;;  %v980_v13 = vld [vmem:[#allocation3 + $0x50] sm:$0xff]  ;;  %v981_v14 = vld [vmem:[#allocation3 + $0x58] sm:$0xff]  ;;  %v996_v17 = vadd.f32 %v1357_v3, %v973_v11  ;;  %v974_v19 = vld [vmem:[#allocation3 + $0x20] sm:$0xff] }
 0x161   : > { %v1009_v15 = vmax.f32 %v993_v4, 0.0  ;;  %v1010_v16 = vmax.f32 %v994_v5, 0.0  ;;  %v1003_v18 = vadd.f32 %v1357_v3, %v980_v13  ;;  %v975_v20 = vld [vmem:[#allocation3 + $0x28] sm:$0xff]  ;;  %v982_v21 = vld [vmem:[#allocation3 + $0x60] sm:$0xff]  ;;  %v1017_v22 = vmax.f32 %v1001_v9, 0.0  ;;  %v976_v27 = vld [vmem:[#allocation3 + $0x30] sm:$0xff] }
 0x162   : > { %v1018_v23 = vmax.f32 %v1002_v10, 0.0  ;;  %v1011_v24 = vmax.f32 %v995_v12, 0.0  ;;  %v1004_v25 = vadd.f32 %v1357_v3, %v981_v14  ;;  %v983_v26 = vld [vmem:[#allocation3 + $0x68] sm:$0xff]  ;;  %v1012_v29 = vmax.f32 %v996_v17, 0.0  ;;  %v977_v32 = vld [vmem:[#allocation3 + $0x38] sm:$0xff]  ;;  %v984_v37 = vld [vmem:[#allocation3 + $0x70] sm:$0xff] }
 0x163   : > { %1499 = vmatpush3.bf16.msra.mxu0 %v1635_v0  ;;  %1519 = vmatpush3.bf16.msra.mxu1 %v1635_v0  ;;  %v1025_v28 = vpack.c.bf16 %v1010_v16, %v1009_v15  ;;  %v1019_v30 = vmax.f32 %v1003_v18, 0.0  ;;  %v997_v31 = vadd.f32 %v1357_v3, %v974_v19  ;;  %v998_v35 = vadd.f32 %v1357_v3, %v975_v20  ;;  %v985_v38 = vld [vmem:[#allocation3 + $0x78] sm:$0xff]  ;;  %v1358_v58 = vld [vmem:[%s1970_s4] ss:$0 sm:$0xff] }
 0x164   : > { %v1029_v33 = vpack.c.bf16 %v1018_v23, %v1017_v22  ;;  %v1020_v34 = vmax.f32 %v1004_v25, 0.0  ;;  %v1005_v36 = vadd.f32 %v1357_v3, %v982_v21  ;;  %v1026_v39 = vpack.c.bf16 %v1012_v29, %v1011_v24 }
 0x165   : > { %1500 = vmatprep.mubr.msk.bf16.mxu0 %vm949_vm1, %v1025_v28  ;;  %v1013_v40 = vmax.f32 %v997_v31, 0.0  ;;  %v1006_v41 = vadd.f32 %v1357_v3, %v983_v26  ;;  %v999_v42 = vadd.f32 %v1357_v3, %v976_v27  ;;  %v1014_v44 = vmax.f32 %v998_v35, 0.0 }
 0x166   : > { %1508 = vmatprep.mubr.msk.bf16.mxu1 %vm949_vm1, %v1029_v33  ;;  %v1030_v43 = vpack.c.bf16 %v1020_v34, %v1019_v30  ;;  %v1021_v45 = vmax.f32 %v1005_v36, 0.0  ;;  %v1000_v46 = vadd.f32 %v1357_v3, %v977_v32  ;;  %1501 = vmatmul.mubr.msk.bf16.vlgmr.msra.gmra.mxu0 %vm949_vm1, %v1026_v39  ;;  %v1007_v49 = vadd.f32 %v1357_v3, %v984_v37 }
 0x167   : > { %v1022_v47 = vmax.f32 %v1006_v41, 0.0  ;;  %v1015_v48 = vmax.f32 %v999_v42, 0.0  ;;  %v1008_v50 = vadd.f32 %v1357_v3, %v985_v38  ;;  %v1027_v51 = vpack.c.bf16 %v1014_v44, %v1013_v40 }
 0x168   : > { %1509 = vmatmul.mubr.msk.bf16.vlgmr.msra.gmra.mxu1 %vm949_vm1, %v1030_v43  ;;  %v1016_v52 = vmax.f32 %v1000_v46, 0.0  ;;  %v1023_v54 = vmax.f32 %v1007_v49, 0.0 }
 0x169   : > { %v1031_v53 = vpack.c.bf16 %v1022_v47, %v1021_v45  ;;  %v1024_v55 = vmax.f32 %v1008_v50, 0.0  ;;  %1504 = vmatprep.mubr.msk.bf16.mxu0 %vm949_vm1, %v1027_v51 }
 0x16a   : > { %v1028_v56 = vpack.c.bf16 %v1016_v52, %v1015_v48 }
 0x16b   : > { %1512 = vmatprep.mubr.msk.bf16.mxu1 %vm949_vm1, %v1031_v53  ;;  %v1032_v57 = vpack.c.bf16 %v1024_v55, %v1023_v54 }
 0x16e   : > { %1505 = vmatmul.mubr.msk.bf16.gmra.mxu0 %vm949_vm1, %v1028_v56 }
 0x170   : > { %1513 = vmatmul.mubr.msk.bf16.gmra.mxu1 %vm949_vm1, %v1032_v57 }
 0x226   : > { %v1502_v59 = vpop.f32.mrf.mxu0 }
 0x227   : > { %v1123_v60 = vadd.f32 %v1502_v59, %v1358_v58 }
 0x228   : > { %v1510_v61 = vpop.f32.mrf.mxu1  ;;  %v1114_v63 = vpop.f32.mrf.mxu0 }
 0x229   : > { %v1155_v62 = vadd.f32 %v1510_v61, %v1358_v58  ;;  %1179 = vst [vmem:[%s1785_s14 + $0x10] sm:$0xff] %v1123_v60  ;;  %v1115_v0 = vadd.f32 %v1358_v58, %v1114_v63 }
 0x22a   : > { %v1146_v1 = vpop.f32.mrf.mxu1  ;;  %v1503_v3 = vpop.f32.mrf.mxu0 }
 0x22b   : > { %1187 = vst [vmem:[%s1785_s14 + $0x50] sm:$0xff] %v1155_v62  ;;  %v1147_v2 = vadd.f32 %v1358_v58, %v1146_v1  ;;  %1177 = vst [vmem:[%s1785_s14] sm:$0xff] %v1115_v0  ;;  %v1126_v4 = vadd.f32 %v1503_v3, %v1358_v58 }
 0x22c   : > { %v1511_v5 = vpop.f32.mrf.mxu1  ;;  %v1117_v7 = vpop.f32.mrf.mxu0 }
 0x22d   : > { %1185 = vst [vmem:[%s1785_s14 + $0x40] sm:$0xff] %v1147_v2  ;;  %v1158_v6 = vadd.f32 %v1511_v5, %v1358_v58  ;;  %1180 = vst [vmem:[%s1785_s14 + $0x18] sm:$0xff] %v1126_v4  ;;  %v1118_v8 = vadd.f32 %v1358_v58, %v1117_v7 }
 0x22e   : > { %v1149_v9 = vpop.f32.mrf.mxu1  ;;  %v1506_v11 = vpop.f32.mrf.mxu0 }
 0x22f   : > { %1188 = vst [vmem:[%s1785_s14 + $0x58] sm:$0xff] %v1158_v6  ;;  %v1150_v10 = vadd.f32 %v1358_v58, %v1149_v9  ;;  %1178 = vst [vmem:[%s1785_s14 + $0x8] sm:$0xff] %v1118_v8  ;;  %v1139_v12 = vadd.f32 %v1506_v11, %v1358_v58 }
 0x230   : > { %v1514_v13 = vpop.f32.mrf.mxu1  ;;  %v1130_v15 = vpop.f32.mrf.mxu0 }
 0x231   : > { %1186 = vst [vmem:[%s1785_s14 + $0x48] sm:$0xff] %v1150_v10  ;;  %v1171_v14 = vadd.f32 %v1514_v13, %v1358_v58  ;;  %1183 = vst [vmem:[%s1785_s14 + $0x30] sm:$0xff] %v1139_v12  ;;  %v1131_v16 = vadd.f32 %v1358_v58, %v1130_v15 }
 0x232   : > { %v1162_v17 = vpop.f32.mrf.mxu1  ;;  %v1507_v19 = vpop.f32.mrf.mxu0 }
 0x233   : > { %1191 = vst [vmem:[%s1785_s14 + $0x70] sm:$0xff] %v1171_v14  ;;  %v1163_v18 = vadd.f32 %v1358_v58, %v1162_v17  ;;  %1181 = vst [vmem:[%s1785_s14 + $0x20] sm:$0xff] %v1131_v16  ;;  %v1142_v20 = vadd.f32 %v1507_v19, %v1358_v58 }
 0x234   : > { %v1515_v21 = vpop.f32.mrf.mxu1  ;;  %v1133_v23 = vpop.f32.mrf.mxu0 }
 0x235   : > { %1189 = vst [vmem:[%s1785_s14 + $0x60] sm:$0xff] %v1163_v18  ;;  %v1174_v22 = vadd.f32 %v1515_v21, %v1358_v58  ;;  %1184 = vst [vmem:[%s1785_s14 + $0x38] sm:$0xff] %v1142_v20  ;;  %v1134_v24 = vadd.f32 %v1358_v58, %v1133_v23 }
 0x236   : > { %v1165_v25 = vpop.f32.mrf.mxu1 }
 0x237   : > { %1192 = vst [vmem:[%s1785_s14 + $0x78] sm:$0xff] %v1174_v22  ;;  %v1166_v26 = vadd.f32 %v1358_v58, %v1165_v25  ;;  %1182 = vst [vmem:[%s1785_s14 + $0x28] sm:$0xff] %v1134_v24 }
 0x239   : > { %1190 = vst [vmem:[%s1785_s14 + $0x68] sm:$0xff] %v1166_v26 }
 0x23a PF: > { %s15_s24 = sadd.s32 1, %s1692_s24   ;;  %s1972_s18 = smov %s1680_s21 }
 0x23b   : > { %p12_p10 = scmp.ge.s32.totalorder %s15_s24, 14   ;;  %s1973_s19 = smov %s1684_s22 }
 0x23c   : > { %s1974_s20 = smov %s1688_s23  ;;  %s1975_s21 = smov %s1979_s25 }
 0x23d   : > { %s1976_s22 = smov %s1983_s26  ;;  %s1977_s23 = smov %s1987_s27 }
 0x23e   :  { %14 = sbr.rel (!%p12_p10) target bundleno = 4 (0x4), region = 118 }
 0x243   :  { %1221 = vsyncmov [#allocation4] }
 0x246   :  { %s1222_s14 = vpop.sfrf %1221 }
 0x247   :  { %p1371_p11 = scmp.ne.s32.totalorder %s1222_s14, 0 }
 0x249   :  { %1226 = shalt.err (%p1371_p11)  }

</bundles_post_ra>
